<compile_context>
chip_gen: v7x
topology: tpu7x:2x2x1
jax: 0.10.0
libtpu: 0.0.40
codegen_flags: <defaults>
</compile_context>

<pallas_src>
import jax
import jax.numpy as jnp
from jax.experimental import pallas as pl
from jax.experimental.pallas import tpu as pltpu  # noqa: F401  (kept for TPU-specific tuning hooks)

# ---- small, module-consistent sizes -----------------------------------------
B = 2        # batch
S = 8        # sequence length
D = 32       # d_model
H = 4        # heads
DK = D // H  # d_k per head
FF = 64      # d_ff
EPS = 1e-6
NEG = -1e9   # masked_fill value from the reference code

D3 = 3 * D
D4 = 4 * D

# row offsets inside the packed "misc" slab (width FF, everything narrower is padded)
ROW_W1 = 0                 # rows [0, D)        cols [0, FF)   : ffn w1
ROW_W2 = D                 # rows [D, D+FF)     cols [0, D)    : ffn w2
ROW_B1 = D + FF            # 1 row              cols [0, FF)   : ffn b1
ROW_B2 = D + FF + 1        # 1 row              cols [0, D)    : ffn b2
ROW_LNA = D + FF + 2       # 3 rows             cols [0, D)    : layernorm scales
ROW_LNB = D + FF + 5       # 3 rows             cols [0, D)    : layernorm biases
MISC_ROWS = D + FF + 8     # = 104


def _decoder_layer_kernel(x_ref, mem_ref, tmask_ref, smask_ref,
                          attn_w_ref, attn_b_ref, misc_ref, o_ref):
    x = x_ref[...]       # (B*S, D) f32
    mem = mem_ref[...]   # (B*S, D) f32

    def layer_norm(z, idx):
        # torch LayerNorm-clone: unbiased std, divide by (std + eps)
        gamma = misc_ref[ROW_LNA + idx:ROW_LNA + idx + 1, 0:D]   # (1, D)
        beta = misc_ref[ROW_LNB + idx:ROW_LNB + idx + 1, 0:D]    # (1, D)
        mean = jnp.mean(z, axis=-1, keepdims=True)
        var = jnp.sum((z - mean) ** 2, axis=-1, keepdims=True) * (1.0 / (D - 1))
        return gamma * (z - mean) / (jnp.sqrt(var) + EPS) + beta

    inv_sqrt_dk = 1.0 / (DK ** 0.5)

    def mha(q_in, kv_in, idx, mask_ref, fused):
        bias = attn_b_ref[idx]                                   # (1, 4D)
        if fused:
            # self-attention: one fused (B*S, D) @ (D, 3D) projection
            qkv = jnp.dot(q_in, attn_w_ref[idx, :, 0:D3],
                          preferred_element_type=jnp.float32) + bias[:, 0:D3]
            qf, kf, vf = qkv[:, 0:D], qkv[:, D:2 * D], qkv[:, 2 * D:D3]
        else:
            # cross-attention: Q from q_in, fused KV from kv_in
            qf = jnp.dot(q_in, attn_w_ref[idx, :, 0:D],
                         preferred_element_type=jnp.float32) + bias[:, 0:D]
            kv = jnp.dot(kv_in, attn_w_ref[idx, :, D:D3],
                         preferred_element_type=jnp.float32) + bias[:, D:D3]
            kf, vf = kv[:, 0:D], kv[:, D:2 * D]

        wo = attn_w_ref[idx, :, D3:D4]                           # (D, D)
        bo = bias[:, D3:D4]                                      # (1, D)

        outs = []
        for bi in range(B):                                      # static unroll
            madd = mask_ref[bi]                                  # (S, S) additive mask
            r0 = bi * S
            acc = jnp.zeros((S, D), jnp.float32)
            for h in range(H):                                   # static unroll
                c0 = h * DK
                qs = qf[r0:r0 + S, c0:c0 + DK]                   # (S, DK)
                ks = kf[r0:r0 + S, c0:c0 + DK]
                vs = vf[r0:r0 + S, c0:c0 + DK]
                sc = jax.lax.dot_general(
                    qs, ks, (((1,), (1,)), ((), ())),
                    preferred_element_type=jnp.float32)          # (S, S)
                sc = sc * inv_sqrt_dk + madd
                sc = sc - jnp.max(sc, axis=-1, keepdims=True)
                p = jnp.exp(sc)
                p = p / jnp.sum(p, axis=-1, keepdims=True)
                hv = jnp.dot(p, vs, preferred_element_type=jnp.float32)   # (S, DK)
                # fold W_o into the head loop: no lane-axis concat of head outputs
                acc = acc + jnp.dot(hv, wo[c0:c0 + DK, :],
                                    preferred_element_type=jnp.float32)   # (S, D)
            outs.append(acc + bo)
        return jnp.concatenate(outs, axis=0)                     # (B*S, D)

    # sublayer 0: x + self_attn(norm(x), norm(x), norm(x), tgt_mask)
    nx = layer_norm(x, 0)
    x1 = x + mha(nx, nx, 0, tmask_ref, True)

    # sublayer 1: x + src_attn(norm(x), memory, memory, src_mask)
    nx1 = layer_norm(x1, 1)
    x2 = x1 + mha(nx1, mem, 1, smask_ref, False)

    # sublayer 2: x + feed_forward(norm(x))
    nx2 = layer_norm(x2, 2)
    w1 = misc_ref[ROW_W1:ROW_W1 + D, :]          # (D, FF)
    b1 = misc_ref[ROW_B1:ROW_B1 + 1, :]          # (1, FF)
    w2 = misc_ref[ROW_W2:ROW_W2 + FF, 0:D]       # (FF, D)
    b2 = misc_ref[ROW_B2:ROW_B2 + 1, 0:D]        # (1, D)
    h1 = jax.nn.relu(jnp.dot(nx2, w1, preferred_element_type=jnp.float32) + b1)
    ff = jnp.dot(h1, w2, preferred_element_type=jnp.float32) + b2

    o_ref[...] = (x2 + ff).astype(o_ref.dtype)
    # TODO(synk): dropout layers are treated as identity (eval mode); training-mode
    # stochastic dropout is not reproduced.


def _pack_params(params):
    (self_w, self_b, src_w, src_b, w1, b1, w2, b2, ln_a, ln_b) = params
    # attention weight slab: (2, D, 4D) = [Wq|Wk|Wv|Wo] for self / src
    attn_w = jnp.stack([
        jnp.concatenate([self_w[0], self_w[1], self_w[2], self_w[3]], axis=1),
        jnp.concatenate([src_w[0], src_w[1], src_w[2], src_w[3]], axis=1),
    ])
    # attention bias slab: (2, 1, 4D) = [bq|bk|bv|bo]
    attn_b = jnp.stack([self_b.reshape(1, D4), src_b.reshape(1, D4)])
    # misc slab: FFN weights/biases + LayerNorm params, padded to width FF
    pad = lambda m: jnp.pad(m, ((0, 0), (0, FF - m.shape[1])))
    misc = jnp.concatenate([
        w1,          # (D, FF)
        pad(w2),     # (FF, FF), cols [0, D) valid
        b1,          # (1, FF)
        pad(b2),     # (1, FF)
        pad(ln_a),   # (3, FF)
        pad(ln_b),   # (3, FF)
    ], axis=0)       # (MISC_ROWS, FF)
    return attn_w, attn_b, misc


def decoder_layer(x, memory, tgt_mask, src_mask, params):
    attn_w, attn_b, misc = _pack_params(params)

    x2d = x.reshape(B * S, D)
    mem2d = memory.reshape(B * S, D)
    # precompute additive masks (0 where visible, -1e9 where blocked)
    tadd = jnp.where(tgt_mask == 0, NEG, 0.0).astype(jnp.float32)
    sadd = jnp.where(src_mask == 0, NEG, 0.0).astype(jnp.float32)

    flops = int(
        2 * (2 * B * S * D * D3)          # self QKV + cross Q/KV projections
        + 2 * (2 * B * S * D * D)         # output projections (folded per head)
        + 4 * (2 * B * H * S * S * DK)    # scores + p@v for both attention blocks
        + 2 * (2 * B * S * D * FF)        # FFN matmuls
    )
    transcendentals = int(2 * B * H * S * S + 3 * B * S)
    bytes_accessed = int(4 * (x2d.size + mem2d.size + tadd.size + sadd.size
                              + attn_w.size + attn_b.size + misc.size + B * S * D))

    out = pl.pallas_call(
        _decoder_layer_kernel,
        out_shape=jax.ShapeDtypeStruct((B * S, D), jnp.float32),
        cost_estimate=pl.CostEstimate(flops=flops,
                                      transcendentals=transcendentals,
                                      bytes_accessed=bytes_accessed),
    )(x2d, mem2d, tadd, sadd, attn_w, attn_b, misc)
    return out.reshape(B, S, D)


# ---- pure-JAX reference (mirrors the PyTorch forward, dropout = identity) ----
def _ref_layer_norm(z, a, b):
    mean = jnp.mean(z, axis=-1, keepdims=True)
    var = jnp.sum((z - mean) ** 2, axis=-1, keepdims=True) / (D - 1)
    return a * (z - mean) / (jnp.sqrt(var) + EPS) + b


def _ref_mha(q_in, kv_in, w, b, mask):
    q = q_in @ w[0] + b[0]
    k = kv_in @ w[1] + b[1]
    v = kv_in @ w[2] + b[2]
    def split(t):  # (B,S,D) -> (B,H,S,DK)
        return t.reshape(t.shape[0], t.shape[1], H, DK).transpose(0, 2, 1, 3)
    qh, kh, vh = split(q), split(k), split(v)
    scores = jnp.einsum("bhqd,bhkd->bhqk", qh, kh) / jnp.sqrt(jnp.float32(DK))
    scores = jnp.where(mask[:, None, :, :] == 0, NEG, scores)
    p = jax.nn.softmax(scores, axis=-1)
    o = jnp.einsum("bhqk,bhkd->bhqd", p, vh)
    o = o.transpose(0, 2, 1, 3).reshape(q.shape[0], q.shape[1], D)
    return o @ w[3] + b[3]


def _ref_decoder_layer(x, memory, tgt_mask, src_mask, params):
    (self_w, self_b, src_w, src_b, w1, b1, w2, b2, ln_a, ln_b) = params
    nx = _ref_layer_norm(x, ln_a[0], ln_b[0])
    x1 = x + _ref_mha(nx, nx, self_w, self_b, tgt_mask)
    nx1 = _ref_layer_norm(x1, ln_a[1], ln_b[1])
    x2 = x1 + _ref_mha(nx1, memory, src_w, src_b, src_mask)
    nx2 = _ref_layer_norm(x2, ln_a[2], ln_b[2])
    ff = jax.nn.relu(nx2 @ w1 + b1[0]) @ w2 + b2[0]
    return x2 + ff


if __name__ == "__main__":
    key = jax.random.PRNGKey(0)
    keys = jax.random.split(key, 12)

    x = jax.random.normal(keys[0], (B, S, D), jnp.float32)
    memory = jax.random.normal(keys[1], (B, S, D), jnp.float32)

    # tgt_mask: causal; src_mask: all-visible (masked_fill semantics: 0 == blocked)
    tgt_mask = jnp.tril(jnp.ones((S, S), jnp.float32))[None].repeat(B, axis=0)
    src_mask = jnp.ones((B, S, S), jnp.float32)

    scale = 0.05
    self_w = scale * jax.random.normal(keys[2], (4, D, D), jnp.float32)
    self_b = scale * jax.random.normal(keys[3], (4, D), jnp.float32)
    src_w = scale * jax.random.normal(keys[4], (4, D, D), jnp.float32)
    src_b = scale * jax.random.normal(keys[5], (4, D), jnp.float32)
    w1 = scale * jax.random.normal(keys[6], (D, FF), jnp.float32)
    b1 = scale * jax.random.normal(keys[7], (1, FF), jnp.float32)
    w2 = scale * jax.random.normal(keys[8], (FF, D), jnp.float32)
    b2 = scale * jax.random.normal(keys[9], (1, D), jnp.float32)
    ln_a = jnp.ones((3, D), jnp.float32) + 0.01 * jax.random.normal(keys[10], (3, D))
    ln_b = 0.01 * jax.random.normal(keys[11], (3, D), jnp.float32)

    params = (self_w, self_b, src_w, src_b, w1, b1, w2, b2, ln_a, ln_b)

    out = decoder_layer(x, memory, tgt_mask, src_mask, params)
    out = jax.block_until_ready(out)

    ref = _ref_decoder_layer(x, memory, tgt_mask, src_mask, params)
    assert out.shape == (B, S, D)
    assert jnp.allclose(out, ref, atol=1e-4, rtol=1e-4), "mismatch vs reference"

    print("KERNEL_OK")
</pallas_src>

<mosaic_0001>
module attributes {stable_mosaic.version = 11 : i64} {
  func.func @_decoder_layer_kernel(%arg0: memref<16x32xf32, #tpu.memory_space<vmem>>, %arg1: memref<16x32xf32, #tpu.memory_space<vmem>>, %arg2: memref<2x8x8xf32, #tpu.memory_space<vmem>>, %arg3: memref<2x8x8xf32, #tpu.memory_space<vmem>>, %arg4: memref<2x32x128xf32, #tpu.memory_space<vmem>>, %arg5: memref<2x1x128xf32, #tpu.memory_space<vmem>>, %arg6: memref<104x64xf32, #tpu.memory_space<vmem>>, %arg7: memref<16x32xf32, #tpu.memory_space<vmem>>) attributes {dimension_semantics = [], scalar_prefetch = 0 : i64, scratch_operands = 0 : i64, tpu.core_type = #tpu.core_type<tc>} {
    %c0 = arith.constant 0 : index
    %c0_0 = arith.constant 0 : index
    %0 = vector.load %arg0[%c0, %c0_0] : memref<16x32xf32, #tpu.memory_space<vmem>>, vector<16x32xf32>
    %c0_1 = arith.constant 0 : index
    %c0_2 = arith.constant 0 : index
    %1 = vector.load %arg1[%c0_1, %c0_2] : memref<16x32xf32, #tpu.memory_space<vmem>>, vector<16x32xf32>
    %c98 = arith.constant 98 : index
    %c0_3 = arith.constant 0 : index
    %2 = vector.load %arg6[%c98, %c0_3] : memref<104x64xf32, #tpu.memory_space<vmem>>, vector<1x32xf32>
    %c101 = arith.constant 101 : index
    %c0_4 = arith.constant 0 : index
    %3 = vector.load %arg6[%c101, %c0_4] : memref<104x64xf32, #tpu.memory_space<vmem>>, vector<1x32xf32>
    %cst = arith.constant dense<0.000000e+00> : vector<16xf32>
    %4 = vector.multi_reduction <add>, %0, %cst [1] : vector<16x32xf32> to vector<16xf32>
    %5 = vector.shape_cast %4 : vector<16xf32> to vector<16x1xf32>
    %cst_5 = arith.constant 3.200000e+01 : f32
    %6 = vector.broadcast %cst_5 : f32 to vector<16x1xf32>
    %7 = arith.divf %5, %6 : vector<16x1xf32>
    %8 = vector.broadcast %7 : vector<16x1xf32> to vector<16x32xf32>
    %9 = arith.subf %0, %8 : vector<16x32xf32>
    %10 = arith.mulf %9, %9 : vector<16x32xf32>
    %cst_6 = arith.constant dense<0.000000e+00> : vector<16xf32>
    %11 = vector.multi_reduction <add>, %10, %cst_6 [1] : vector<16x32xf32> to vector<16xf32>
    %12 = vector.shape_cast %11 : vector<16xf32> to vector<16x1xf32>
    %cst_7 = arith.constant 0.0322580636 : f32
    %13 = vector.broadcast %cst_7 : f32 to vector<16x1xf32>
    %14 = arith.mulf %12, %13 : vector<16x1xf32>
    %15 = vector.broadcast %7 : vector<16x1xf32> to vector<16x32xf32>
    %16 = arith.subf %0, %15 : vector<16x32xf32>
    %17 = vector.broadcast %2 : vector<1x32xf32> to vector<16x32xf32>
    %18 = arith.mulf %17, %16 : vector<16x32xf32>
    %19 = math.sqrt %14 : vector<16x1xf32>
    %cst_8 = arith.constant 9.99999997E-7 : f32
    %20 = vector.broadcast %cst_8 : f32 to vector<16x1xf32>
    %21 = arith.addf %19, %20 : vector<16x1xf32>
    %22 = vector.broadcast %21 : vector<16x1xf32> to vector<16x32xf32>
    %23 = arith.divf %18, %22 : vector<16x32xf32>
    %24 = vector.broadcast %3 : vector<1x32xf32> to vector<16x32xf32>
    %25 = arith.addf %23, %24 : vector<16x32xf32>
    %c0_9 = arith.constant 0 : index
    %c0_10 = arith.constant 0 : index
    %c0_11 = arith.constant 0 : index
    %26 = vector.load %arg5[%c0_9, %c0_10, %c0_11] : memref<2x1x128xf32, #tpu.memory_space<vmem>>, vector<1x1x128xf32>
    %27 = vector.shape_cast %26 : vector<1x1x128xf32> to vector<1x128xf32>
    %c0_12 = arith.constant 0 : index
    %c0_13 = arith.constant 0 : index
    %c0_14 = arith.constant 0 : index
    %28 = vector.load %arg4[%c0_12, %c0_13, %c0_14] : memref<2x32x128xf32, #tpu.memory_space<vmem>>, vector<1x32x96xf32>
    %29 = vector.shape_cast %28 : vector<1x32x96xf32> to vector<32x96xf32>
    %cst_15 = arith.constant dense<0.000000e+00> : vector<16x96xf32>
    %30 = tpu.matmul %25, %29, %cst_15 {dimension_numbers = #tpu.dot_dimension_numbers<[1], [0], [0], [1], [0, 0, 1, 1], [], []>} : vector<16x32xf32>, vector<32x96xf32>, vector<16x96xf32> -> vector<16x96xf32>
    %31 = vector.extract_strided_slice %27 {offsets = [0, 0], sizes = [1, 96], strides = [1, 1]} : vector<1x128xf32> to vector<1x96xf32>
    %32 = vector.broadcast %31 : vector<1x96xf32> to vector<16x96xf32>
    %33 = arith.addf %30, %32 : vector<16x96xf32>
    %34 = vector.extract_strided_slice %33 {offsets = [0, 0], sizes = [16, 32], strides = [1, 1]} : vector<16x96xf32> to vector<16x32xf32>
    %35 = vector.extract_strided_slice %33 {offsets = [0, 32], sizes = [16, 32], strides = [1, 1]} : vector<16x96xf32> to vector<16x32xf32>
    %36 = vector.extract_strided_slice %33 {offsets = [0, 64], sizes = [16, 32], strides = [1, 1]} : vector<16x96xf32> to vector<16x32xf32>
    %c0_16 = arith.constant 0 : index
    %c0_17 = arith.constant 0 : index
    %c96 = arith.constant 96 : index
    %37 = vector.load %arg4[%c0_16, %c0_17, %c96] : memref<2x32x128xf32, #tpu.memory_space<vmem>>, vector<1x32x32xf32>
    %38 = vector.shape_cast %37 : vector<1x32x32xf32> to vector<32x32xf32>
    %39 = vector.extract_strided_slice %27 {offsets = [0, 96], sizes = [1, 32], strides = [1, 1]} : vector<1x128xf32> to vector<1x32xf32>
    %c0_18 = arith.constant 0 : index
    %c0_19 = arith.constant 0 : index
    %c0_20 = arith.constant 0 : index
    %40 = vector.load %arg2[%c0_18, %c0_19, %c0_20] : memref<2x8x8xf32, #tpu.memory_space<vmem>>, vector<1x8x8xf32>
    %41 = vector.shape_cast %40 : vector<1x8x8xf32> to vector<8x8xf32>
    %cst_21 = arith.constant 0.000000e+00 : f32
    %42 = vector.broadcast %cst_21 : f32 to vector<8x32xf32>
    %43 = vector.extract_strided_slice %34 {offsets = [0, 0], sizes = [8, 8], strides = [1, 1]} : vector<16x32xf32> to vector<8x8xf32>
    %44 = vector.extract_strided_slice %35 {offsets = [0, 0], sizes = [8, 8], strides = [1, 1]} : vector<16x32xf32> to vector<8x8xf32>
    %45 = vector.extract_strided_slice %36 {offsets = [0, 0], sizes = [8, 8], strides = [1, 1]} : vector<16x32xf32> to vector<8x8xf32>
    %cst_22 = arith.constant dense<0.000000e+00> : vector<8x8xf32>
    %46 = tpu.matmul %43, %44, %cst_22 {dimension_numbers = #tpu.dot_dimension_numbers<[1], [1], [0], [0], [0, 0, 1, 0], [], []>} : vector<8x8xf32>, vector<8x8xf32>, vector<8x8xf32> -> vector<8x8xf32>
    %cst_23 = arith.constant 0.353553385 : f32
    %47 = vector.broadcast %cst_23 : f32 to vector<8x8xf32>
    %48 = arith.mulf %46, %47 : vector<8x8xf32>
    %49 = arith.addf %48, %41 : vector<8x8xf32>
    %cst_24 = arith.constant dense<0xFF800000> : vector<8xf32>
    %50 = vector.multi_reduction <maximumf>, %49, %cst_24 [1] : vector<8x8xf32> to vector<8xf32>
    %51 = vector.shape_cast %50 : vector<8xf32> to vector<8x1xf32>
    %52 = vector.broadcast %51 : vector<8x1xf32> to vector<8x8xf32>
    %53 = arith.subf %49, %52 : vector<8x8xf32>
    %54 = math.exp %53 : vector<8x8xf32>
    %cst_25 = arith.constant dense<0.000000e+00> : vector<8xf32>
    %55 = vector.multi_reduction <add>, %54, %cst_25 [1] : vector<8x8xf32> to vector<8xf32>
    %56 = vector.shape_cast %55 : vector<8xf32> to vector<8x1xf32>
    %57 = vector.broadcast %56 : vector<8x1xf32> to vector<8x8xf32>
    %58 = arith.divf %54, %57 : vector<8x8xf32>
    %cst_26 = arith.constant dense<0.000000e+00> : vector<8x8xf32>
    %59 = tpu.matmul %58, %45, %cst_26 {dimension_numbers = #tpu.dot_dimension_numbers<[1], [0], [0], [1], [0, 0, 1, 1], [], []>} : vector<8x8xf32>, vector<8x8xf32>, vector<8x8xf32> -> vector<8x8xf32>
    %60 = vector.extract_strided_slice %38 {offsets = [0, 0], sizes = [8, 32], strides = [1, 1]} : vector<32x32xf32> to vector<8x32xf32>
    %cst_27 = arith.constant dense<0.000000e+00> : vector<8x32xf32>
    %61 = tpu.matmul %59, %60, %cst_27 {dimension_numbers = #tpu.dot_dimension_numbers<[1], [0], [0], [1], [0, 0, 1, 1], [], []>} : vector<8x8xf32>, vector<8x32xf32>, vector<8x32xf32> -> vector<8x32xf32>
    %62 = arith.addf %42, %61 : vector<8x32xf32>
    %63 = vector.extract_strided_slice %34 {offsets = [0, 8], sizes = [8, 8], strides = [1, 1]} : vector<16x32xf32> to vector<8x8xf32>
    %64 = vector.extract_strided_slice %35 {offsets = [0, 8], sizes = [8, 8], strides = [1, 1]} : vector<16x32xf32> to vector<8x8xf32>
    %65 = vector.extract_strided_slice %36 {offsets = [0, 8], sizes = [8, 8], strides = [1, 1]} : vector<16x32xf32> to vector<8x8xf32>
    %cst_28 = arith.constant dense<0.000000e+00> : vector<8x8xf32>
    %66 = tpu.matmul %63, %64, %cst_28 {dimension_numbers = #tpu.dot_dimension_numbers<[1], [1], [0], [0], [0, 0, 1, 0], [], []>} : vector<8x8xf32>, vector<8x8xf32>, vector<8x8xf32> -> vector<8x8xf32>
    %cst_29 = arith.constant 0.353553385 : f32
    %67 = vector.broadcast %cst_29 : f32 to vector<8x8xf32>
    %68 = arith.mulf %66, %67 : vector<8x8xf32>
    %69 = arith.addf %68, %41 : vector<8x8xf32>
    %cst_30 = arith.constant dense<0xFF800000> : vector<8xf32>
    %70 = vector.multi_reduction <maximumf>, %69, %cst_30 [1] : vector<8x8xf32> to vector<8xf32>
    %71 = vector.shape_cast %70 : vector<8xf32> to vector<8x1xf32>
    %72 = vector.broadcast %71 : vector<8x1xf32> to vector<8x8xf32>
    %73 = arith.subf %69, %72 : vector<8x8xf32>
    %74 = math.exp %73 : vector<8x8xf32>
    %cst_31 = arith.constant dense<0.000000e+00> : vector<8xf32>
    %75 = vector.multi_reduction <add>, %74, %cst_31 [1] : vector<8x8xf32> to vector<8xf32>
    %76 = vector.shape_cast %75 : vector<8xf32> to vector<8x1xf32>
    %77 = vector.broadcast %76 : vector<8x1xf32> to vector<8x8xf32>
    %78 = arith.divf %74, %77 : vector<8x8xf32>
    %cst_32 = arith.constant dense<0.000000e+00> : vector<8x8xf32>
    %79 = tpu.matmul %78, %65, %cst_32 {dimension_numbers = #tpu.dot_dimension_numbers<[1], [0], [0], [1], [0, 0, 1, 1], [], []>} : vector<8x8xf32>, vector<8x8xf32>, vector<8x8xf32> -> vector<8x8xf32>
    %80 = vector.extract_strided_slice %38 {offsets = [8, 0], sizes = [8, 32], strides = [1, 1]} : vector<32x32xf32> to vector<8x32xf32>
    %cst_33 = arith.constant dense<0.000000e+00> : vector<8x32xf32>
    %81 = tpu.matmul %79, %80, %cst_33 {dimension_numbers = #tpu.dot_dimension_numbers<[1], [0], [0], [1], [0, 0, 1, 1], [], []>} : vector<8x8xf32>, vector<8x32xf32>, vector<8x32xf32> -> vector<8x32xf32>
    %82 = arith.addf %62, %81 : vector<8x32xf32>
    %83 = vector.extract_strided_slice %34 {offsets = [0, 16], sizes = [8, 8], strides = [1, 1]} : vector<16x32xf32> to vector<8x8xf32>
    %84 = vector.extract_strided_slice %35 {offsets = [0, 16], sizes = [8, 8], strides = [1, 1]} : vector<16x32xf32> to vector<8x8xf32>
    %85 = vector.extract_strided_slice %36 {offsets = [0, 16], sizes = [8, 8], strides = [1, 1]} : vector<16x32xf32> to vector<8x8xf32>
    %cst_34 = arith.constant dense<0.000000e+00> : vector<8x8xf32>
    %86 = tpu.matmul %83, %84, %cst_34 {dimension_numbers = #tpu.dot_dimension_numbers<[1], [1], [0], [0], [0, 0, 1, 0], [], []>} : vector<8x8xf32>, vector<8x8xf32>, vector<8x8xf32> -> vector<8x8xf32>
    %cst_35 = arith.constant 0.353553385 : f32
    %87 = vector.broadcast %cst_35 : f32 to vector<8x8xf32>
    %88 = arith.mulf %86, %87 : vector<8x8xf32>
    %89 = arith.addf %88, %41 : vector<8x8xf32>
    %cst_36 = arith.constant dense<0xFF800000> : vector<8xf32>
    %90 = vector.multi_reduction <maximumf>, %89, %cst_36 [1] : vector<8x8xf32> to vector<8xf32>
    %91 = vector.shape_cast %90 : vector<8xf32> to vector<8x1xf32>
    %92 = vector.broadcast %91 : vector<8x1xf32> to vector<8x8xf32>
    %93 = arith.subf %89, %92 : vector<8x8xf32>
    %94 = math.exp %93 : vector<8x8xf32>
    %cst_37 = arith.constant dense<0.000000e+00> : vector<8xf32>
    %95 = vector.multi_reduction <add>, %94, %cst_37 [1] : vector<8x8xf32> to vector<8xf32>
    %96 = vector.shape_cast %95 : vector<8xf32> to vector<8x1xf32>
    %97 = vector.broadcast %96 : vector<8x1xf32> to vector<8x8xf32>
    %98 = arith.divf %94, %97 : vector<8x8xf32>
    %cst_38 = arith.constant dense<0.000000e+00> : vector<8x8xf32>
    %99 = tpu.matmul %98, %85, %cst_38 {dimension_numbers = #tpu.dot_dimension_numbers<[1], [0], [0], [1], [0, 0, 1, 1], [], []>} : vector<8x8xf32>, vector<8x8xf32>, vector<8x8xf32> -> vector<8x8xf32>
    %100 = vector.extract_strided_slice %38 {offsets = [16, 0], sizes = [8, 32], strides = [1, 1]} : vector<32x32xf32> to vector<8x32xf32>
    %cst_39 = arith.constant dense<0.000000e+00> : vector<8x32xf32>
    %101 = tpu.matmul %99, %100, %cst_39 {dimension_numbers = #tpu.dot_dimension_numbers<[1], [0], [0], [1], [0, 0, 1, 1], [], []>} : vector<8x8xf32>, vector<8x32xf32>, vector<8x32xf32> -> vector<8x32xf32>
    %102 = arith.addf %82, %101 : vector<8x32xf32>
    %103 = vector.extract_strided_slice %34 {offsets = [0, 24], sizes = [8, 8], strides = [1, 1]} : vector<16x32xf32> to vector<8x8xf32>
    %104 = vector.extract_strided_slice %35 {offsets = [0, 24], sizes = [8, 8], strides = [1, 1]} : vector<16x32xf32> to vector<8x8xf32>
    %105 = vector.extract_strided_slice %36 {offsets = [0, 24], sizes = [8, 8], strides = [1, 1]} : vector<16x32xf32> to vector<8x8xf32>
    %cst_40 = arith.constant dense<0.000000e+00> : vector<8x8xf32>
    %106 = tpu.matmul %103, %104, %cst_40 {dimension_numbers = #tpu.dot_dimension_numbers<[1], [1], [0], [0], [0, 0, 1, 0], [], []>} : vector<8x8xf32>, vector<8x8xf32>, vector<8x8xf32> -> vector<8x8xf32>
    %cst_41 = arith.constant 0.353553385 : f32
    %107 = vector.broadcast %cst_41 : f32 to vector<8x8xf32>
    %108 = arith.mulf %106, %107 : vector<8x8xf32>
    %109 = arith.addf %108, %41 : vector<8x8xf32>
    %cst_42 = arith.constant dense<0xFF800000> : vector<8xf32>
    %110 = vector.multi_reduction <maximumf>, %109, %cst_42 [1] : vector<8x8xf32> to vector<8xf32>
    %111 = vector.shape_cast %110 : vector<8xf32> to vector<8x1xf32>
    %112 = vector.broadcast %111 : vector<8x1xf32> to vector<8x8xf32>
    %113 = arith.subf %109, %112 : vector<8x8xf32>
    %114 = math.exp %113 : vector<8x8xf32>
    %cst_43 = arith.constant dense<0.000000e+00> : vector<8xf32>
    %115 = vector.multi_reduction <add>, %114, %cst_43 [1] : vector<8x8xf32> to vector<8xf32>
    %116 = vector.shape_cast %115 : vector<8xf32> to vector<8x1xf32>
    %117 = vector.broadcast %116 : vector<8x1xf32> to vector<8x8xf32>
    %118 = arith.divf %114, %117 : vector<8x8xf32>
    %cst_44 = arith.constant dense<0.000000e+00> : vector<8x8xf32>
    %119 = tpu.matmul %118, %105, %cst_44 {dimension_numbers = #tpu.dot_dimension_numbers<[1], [0], [0], [1], [0, 0, 1, 1], [], []>} : vector<8x8xf32>, vector<8x8xf32>, vector<8x8xf32> -> vector<8x8xf32>
    %120 = vector.extract_strided_slice %38 {offsets = [24, 0], sizes = [8, 32], strides = [1, 1]} : vector<32x32xf32> to vector<8x32xf32>
    %cst_45 = arith.constant dense<0.000000e+00> : vector<8x32xf32>
    %121 = tpu.matmul %119, %120, %cst_45 {dimension_numbers = #tpu.dot_dimension_numbers<[1], [0], [0], [1], [0, 0, 1, 1], [], []>} : vector<8x8xf32>, vector<8x32xf32>, vector<8x32xf32> -> vector<8x32xf32>
    %122 = arith.addf %102, %121 : vector<8x32xf32>
    %123 = vector.broadcast %39 : vector<1x32xf32> to vector<8x32xf32>
    %124 = arith.addf %122, %123 : vector<8x32xf32>
    %c1 = arith.constant 1 : index
    %c0_46 = arith.constant 0 : index
    %c0_47 = arith.constant 0 : index
    %125 = vector.load %arg2[%c1, %c0_46, %c0_47] : memref<2x8x8xf32, #tpu.memory_space<vmem>>, vector<1x8x8xf32>
    %126 = vector.shape_cast %125 : vector<1x8x8xf32> to vector<8x8xf32>
    %cst_48 = arith.constant 0.000000e+00 : f32
    %127 = vector.broadcast %cst_48 : f32 to vector<8x32xf32>
    %128 = vector.extract_strided_slice %34 {offsets = [8, 0], sizes = [8, 8], strides = [1, 1]} : vector<16x32xf32> to vector<8x8xf32>
    %129 = vector.extract_strided_slice %35 {offsets = [8, 0], sizes = [8, 8], strides = [1, 1]} : vector<16x32xf32> to vector<8x8xf32>
    %130 = vector.extract_strided_slice %36 {offsets = [8, 0], sizes = [8, 8], strides = [1, 1]} : vector<16x32xf32> to vector<8x8xf32>
    %cst_49 = arith.constant dense<0.000000e+00> : vector<8x8xf32>
    %131 = tpu.matmul %128, %129, %cst_49 {dimension_numbers = #tpu.dot_dimension_numbers<[1], [1], [0], [0], [0, 0, 1, 0], [], []>} : vector<8x8xf32>, vector<8x8xf32>, vector<8x8xf32> -> vector<8x8xf32>
    %cst_50 = arith.constant 0.353553385 : f32
    %132 = vector.broadcast %cst_50 : f32 to vector<8x8xf32>
    %133 = arith.mulf %131, %132 : vector<8x8xf32>
    %134 = arith.addf %133, %126 : vector<8x8xf32>
    %cst_51 = arith.constant dense<0xFF800000> : vector<8xf32>
    %135 = vector.multi_reduction <maximumf>, %134, %cst_51 [1] : vector<8x8xf32> to vector<8xf32>
    %136 = vector.shape_cast %135 : vector<8xf32> to vector<8x1xf32>
    %137 = vector.broadcast %136 : vector<8x1xf32> to vector<8x8xf32>
    %138 = arith.subf %134, %137 : vector<8x8xf32>
    %139 = math.exp %138 : vector<8x8xf32>
    %cst_52 = arith.constant dense<0.000000e+00> : vector<8xf32>
    %140 = vector.multi_reduction <add>, %139, %cst_52 [1] : vector<8x8xf32> to vector<8xf32>
    %141 = vector.shape_cast %140 : vector<8xf32> to vector<8x1xf32>
    %142 = vector.broadcast %141 : vector<8x1xf32> to vector<8x8xf32>
    %143 = arith.divf %139, %142 : vector<8x8xf32>
    %cst_53 = arith.constant dense<0.000000e+00> : vector<8x8xf32>
    %144 = tpu.matmul %143, %130, %cst_53 {dimension_numbers = #tpu.dot_dimension_numbers<[1], [0], [0], [1], [0, 0, 1, 1], [], []>} : vector<8x8xf32>, vector<8x8xf32>, vector<8x8xf32> -> vector<8x8xf32>
    %145 = vector.extract_strided_slice %38 {offsets = [0, 0], sizes = [8, 32], strides = [1, 1]} : vector<32x32xf32> to vector<8x32xf32>
    %cst_54 = arith.constant dense<0.000000e+00> : vector<8x32xf32>
    %146 = tpu.matmul %144, %145, %cst_54 {dimension_numbers = #tpu.dot_dimension_numbers<[1], [0], [0], [1], [0, 0, 1, 1], [], []>} : vector<8x8xf32>, vector<8x32xf32>, vector<8x32xf32> -> vector<8x32xf32>
    %147 = arith.addf %127, %146 : vector<8x32xf32>
    %148 = vector.extract_strided_slice %34 {offsets = [8, 8], sizes = [8, 8], strides = [1, 1]} : vector<16x32xf32> to vector<8x8xf32>
    %149 = vector.extract_strided_slice %35 {offsets = [8, 8], sizes = [8, 8], strides = [1, 1]} : vector<16x32xf32> to vector<8x8xf32>
    %150 = vector.extract_strided_slice %36 {offsets = [8, 8], sizes = [8, 8], strides = [1, 1]} : vector<16x32xf32> to vector<8x8xf32>
    %cst_55 = arith.constant dense<0.000000e+00> : vector<8x8xf32>
    %151 = tpu.matmul %148, %149, %cst_55 {dimension_numbers = #tpu.dot_dimension_numbers<[1], [1], [0], [0], [0, 0, 1, 0], [], []>} : vector<8x8xf32>, vector<8x8xf32>, vector<8x8xf32> -> vector<8x8xf32>
    %cst_56 = arith.constant 0.353553385 : f32
    %152 = vector.broadcast %cst_56 : f32 to vector<8x8xf32>
    %153 = arith.mulf %151, %152 : vector<8x8xf32>
    %154 = arith.addf %153, %126 : vector<8x8xf32>
    %cst_57 = arith.constant dense<0xFF800000> : vector<8xf32>
    %155 = vector.multi_reduction <maximumf>, %154, %cst_57 [1] : vector<8x8xf32> to vector<8xf32>
    %156 = vector.shape_cast %155 : vector<8xf32> to vector<8x1xf32>
    %157 = vector.broadcast %156 : vector<8x1xf32> to vector<8x8xf32>
    %158 = arith.subf %154, %157 : vector<8x8xf32>
    %159 = math.exp %158 : vector<8x8xf32>
    %cst_58 = arith.constant dense<0.000000e+00> : vector<8xf32>
    %160 = vector.multi_reduction <add>, %159, %cst_58 [1] : vector<8x8xf32> to vector<8xf32>
    %161 = vector.shape_cast %160 : vector<8xf32> to vector<8x1xf32>
    %162 = vector.broadcast %161 : vector<8x1xf32> to vector<8x8xf32>
    %163 = arith.divf %159, %162 : vector<8x8xf32>
    %cst_59 = arith.constant dense<0.000000e+00> : vector<8x8xf32>
    %164 = tpu.matmul %163, %150, %cst_59 {dimension_numbers = #tpu.dot_dimension_numbers<[1], [0], [0], [1], [0, 0, 1, 1], [], []>} : vector<8x8xf32>, vector<8x8xf32>, vector<8x8xf32> -> vector<8x8xf32>
    %165 = vector.extract_strided_slice %38 {offsets = [8, 0], sizes = [8, 32], strides = [1, 1]} : vector<32x32xf32> to vector<8x32xf32>
    %cst_60 = arith.constant dense<0.000000e+00> : vector<8x32xf32>
    %166 = tpu.matmul %164, %165, %cst_60 {dimension_numbers = #tpu.dot_dimension_numbers<[1], [0], [0], [1], [0, 0, 1, 1], [], []>} : vector<8x8xf32>, vector<8x32xf32>, vector<8x32xf32> -> vector<8x32xf32>
    %167 = arith.addf %147, %166 : vector<8x32xf32>
    %168 = vector.extract_strided_slice %34 {offsets = [8, 16], sizes = [8, 8], strides = [1, 1]} : vector<16x32xf32> to vector<8x8xf32>
    %169 = vector.extract_strided_slice %35 {offsets = [8, 16], sizes = [8, 8], strides = [1, 1]} : vector<16x32xf32> to vector<8x8xf32>
    %170 = vector.extract_strided_slice %36 {offsets = [8, 16], sizes = [8, 8], strides = [1, 1]} : vector<16x32xf32> to vector<8x8xf32>
    %cst_61 = arith.constant dense<0.000000e+00> : vector<8x8xf32>
    %171 = tpu.matmul %168, %169, %cst_61 {dimension_numbers = #tpu.dot_dimension_numbers<[1], [1], [0], [0], [0, 0, 1, 0], [], []>} : vector<8x8xf32>, vector<8x8xf32>, vector<8x8xf32> -> vector<8x8xf32>
    %cst_62 = arith.constant 0.353553385 : f32
    %172 = vector.broadcast %cst_62 : f32 to vector<8x8xf32>
    %173 = arith.mulf %171, %172 : vector<8x8xf32>
    %174 = arith.addf %173, %126 : vector<8x8xf32>
    %cst_63 = arith.constant dense<0xFF800000> : vector<8xf32>
    %175 = vector.multi_reduction <maximumf>, %174, %cst_63 [1] : vector<8x8xf32> to vector<8xf32>
    %176 = vector.shape_cast %175 : vector<8xf32> to vector<8x1xf32>
    %177 = vector.broadcast %176 : vector<8x1xf32> to vector<8x8xf32>
    %178 = arith.subf %174, %177 : vector<8x8xf32>
    %179 = math.exp %178 : vector<8x8xf32>
    %cst_64 = arith.constant dense<0.000000e+00> : vector<8xf32>
    %180 = vector.multi_reduction <add>, %179, %cst_64 [1] : vector<8x8xf32> to vector<8xf32>
    %181 = vector.shape_cast %180 : vector<8xf32> to vector<8x1xf32>
    %182 = vector.broadcast %181 : vector<8x1xf32> to vector<8x8xf32>
    %183 = arith.divf %179, %182 : vector<8x8xf32>
    %cst_65 = arith.constant dense<0.000000e+00> : vector<8x8xf32>
    %184 = tpu.matmul %183, %170, %cst_65 {dimension_numbers = #tpu.dot_dimension_numbers<[1], [0], [0], [1], [0, 0, 1, 1], [], []>} : vector<8x8xf32>, vector<8x8xf32>, vector<8x8xf32> -> vector<8x8xf32>
    %185 = vector.extract_strided_slice %38 {offsets = [16, 0], sizes = [8, 32], strides = [1, 1]} : vector<32x32xf32> to vector<8x32xf32>
    %cst_66 = arith.constant dense<0.000000e+00> : vector<8x32xf32>
    %186 = tpu.matmul %184, %185, %cst_66 {dimension_numbers = #tpu.dot_dimension_numbers<[1], [0], [0], [1], [0, 0, 1, 1], [], []>} : vector<8x8xf32>, vector<8x32xf32>, vector<8x32xf32> -> vector<8x32xf32>
    %187 = arith.addf %167, %186 : vector<8x32xf32>
    %188 = vector.extract_strided_slice %34 {offsets = [8, 24], sizes = [8, 8], strides = [1, 1]} : vector<16x32xf32> to vector<8x8xf32>
    %189 = vector.extract_strided_slice %35 {offsets = [8, 24], sizes = [8, 8], strides = [1, 1]} : vector<16x32xf32> to vector<8x8xf32>
    %190 = vector.extract_strided_slice %36 {offsets = [8, 24], sizes = [8, 8], strides = [1, 1]} : vector<16x32xf32> to vector<8x8xf32>
    %cst_67 = arith.constant dense<0.000000e+00> : vector<8x8xf32>
    %191 = tpu.matmul %188, %189, %cst_67 {dimension_numbers = #tpu.dot_dimension_numbers<[1], [1], [0], [0], [0, 0, 1, 0], [], []>} : vector<8x8xf32>, vector<8x8xf32>, vector<8x8xf32> -> vector<8x8xf32>
    %cst_68 = arith.constant 0.353553385 : f32
    %192 = vector.broadcast %cst_68 : f32 to vector<8x8xf32>
    %193 = arith.mulf %191, %192 : vector<8x8xf32>
    %194 = arith.addf %193, %126 : vector<8x8xf32>
    %cst_69 = arith.constant dense<0xFF800000> : vector<8xf32>
    %195 = vector.multi_reduction <maximumf>, %194, %cst_69 [1] : vector<8x8xf32> to vector<8xf32>
    %196 = vector.shape_cast %195 : vector<8xf32> to vector<8x1xf32>
    %197 = vector.broadcast %196 : vector<8x1xf32> to vector<8x8xf32>
    %198 = arith.subf %194, %197 : vector<8x8xf32>
    %199 = math.exp %198 : vector<8x8xf32>
    %cst_70 = arith.constant dense<0.000000e+00> : vector<8xf32>
    %200 = vector.multi_reduction <add>, %199, %cst_70 [1] : vector<8x8xf32> to vector<8xf32>
    %201 = vector.shape_cast %200 : vector<8xf32> to vector<8x1xf32>
    %202 = vector.broadcast %201 : vector<8x1xf32> to vector<8x8xf32>
    %203 = arith.divf %199, %202 : vector<8x8xf32>
    %cst_71 = arith.constant dense<0.000000e+00> : vector<8x8xf32>
    %204 = tpu.matmul %203, %190, %cst_71 {dimension_numbers = #tpu.dot_dimension_numbers<[1], [0], [0], [1], [0, 0, 1, 1], [], []>} : vector<8x8xf32>, vector<8x8xf32>, vector<8x8xf32> -> vector<8x8xf32>
    %205 = vector.extract_strided_slice %38 {offsets = [24, 0], sizes = [8, 32], strides = [1, 1]} : vector<32x32xf32> to vector<8x32xf32>
    %cst_72 = arith.constant dense<0.000000e+00> : vector<8x32xf32>
    %206 = tpu.matmul %204, %205, %cst_72 {dimension_numbers = #tpu.dot_dimension_numbers<[1], [0], [0], [1], [0, 0, 1, 1], [], []>} : vector<8x8xf32>, vector<8x32xf32>, vector<8x32xf32> -> vector<8x32xf32>
    %207 = arith.addf %187, %206 : vector<8x32xf32>
    %208 = vector.broadcast %39 : vector<1x32xf32> to vector<8x32xf32>
    %209 = arith.addf %207, %208 : vector<8x32xf32>
    %210 = tpu.concatenate %124, %209 in 0 : vector<8x32xf32>, vector<8x32xf32> -> vector<16x32xf32>
    %211 = arith.addf %0, %210 : vector<16x32xf32>
    %c99 = arith.constant 99 : index
    %c0_73 = arith.constant 0 : index
    %212 = vector.load %arg6[%c99, %c0_73] : memref<104x64xf32, #tpu.memory_space<vmem>>, vector<1x32xf32>
    %c102 = arith.constant 102 : index
    %c0_74 = arith.constant 0 : index
    %213 = vector.load %arg6[%c102, %c0_74] : memref<104x64xf32, #tpu.memory_space<vmem>>, vector<1x32xf32>
    %cst_75 = arith.constant dense<0.000000e+00> : vector<16xf32>
    %214 = vector.multi_reduction <add>, %211, %cst_75 [1] : vector<16x32xf32> to vector<16xf32>
    %215 = vector.shape_cast %214 : vector<16xf32> to vector<16x1xf32>
    %cst_76 = arith.constant 3.200000e+01 : f32
    %216 = vector.broadcast %cst_76 : f32 to vector<16x1xf32>
    %217 = arith.divf %215, %216 : vector<16x1xf32>
    %218 = vector.broadcast %217 : vector<16x1xf32> to vector<16x32xf32>
    %219 = arith.subf %211, %218 : vector<16x32xf32>
    %220 = arith.mulf %219, %219 : vector<16x32xf32>
    %cst_77 = arith.constant dense<0.000000e+00> : vector<16xf32>
    %221 = vector.multi_reduction <add>, %220, %cst_77 [1] : vector<16x32xf32> to vector<16xf32>
    %222 = vector.shape_cast %221 : vector<16xf32> to vector<16x1xf32>
    %cst_78 = arith.constant 0.0322580636 : f32
    %223 = vector.broadcast %cst_78 : f32 to vector<16x1xf32>
    %224 = arith.mulf %222, %223 : vector<16x1xf32>
    %225 = vector.broadcast %217 : vector<16x1xf32> to vector<16x32xf32>
    %226 = arith.subf %211, %225 : vector<16x32xf32>
    %227 = vector.broadcast %212 : vector<1x32xf32> to vector<16x32xf32>
    %228 = arith.mulf %227, %226 : vector<16x32xf32>
    %229 = math.sqrt %224 : vector<16x1xf32>
    %cst_79 = arith.constant 9.99999997E-7 : f32
    %230 = vector.broadcast %cst_79 : f32 to vector<16x1xf32>
    %231 = arith.addf %229, %230 : vector<16x1xf32>
    %232 = vector.broadcast %231 : vector<16x1xf32> to vector<16x32xf32>
    %233 = arith.divf %228, %232 : vector<16x32xf32>
    %234 = vector.broadcast %213 : vector<1x32xf32> to vector<16x32xf32>
    %235 = arith.addf %233, %234 : vector<16x32xf32>
    %c1_80 = arith.constant 1 : index
    %c0_81 = arith.constant 0 : index
    %c0_82 = arith.constant 0 : index
    %236 = vector.load %arg5[%c1_80, %c0_81, %c0_82] : memref<2x1x128xf32, #tpu.memory_space<vmem>>, vector<1x1x128xf32>
    %237 = vector.shape_cast %236 : vector<1x1x128xf32> to vector<1x128xf32>
    %c1_83 = arith.constant 1 : index
    %c0_84 = arith.constant 0 : index
    %c0_85 = arith.constant 0 : index
    %238 = vector.load %arg4[%c1_83, %c0_84, %c0_85] : memref<2x32x128xf32, #tpu.memory_space<vmem>>, vector<1x32x32xf32>
    %239 = vector.shape_cast %238 : vector<1x32x32xf32> to vector<32x32xf32>
    %cst_86 = arith.constant dense<0.000000e+00> : vector<16x32xf32>
    %240 = tpu.matmul %235, %239, %cst_86 {dimension_numbers = #tpu.dot_dimension_numbers<[1], [0], [0], [1], [0, 0, 1, 1], [], []>} : vector<16x32xf32>, vector<32x32xf32>, vector<16x32xf32> -> vector<16x32xf32>
    %241 = vector.extract_strided_slice %237 {offsets = [0, 0], sizes = [1, 32], strides = [1, 1]} : vector<1x128xf32> to vector<1x32xf32>
    %242 = vector.broadcast %241 : vector<1x32xf32> to vector<16x32xf32>
    %243 = arith.addf %240, %242 : vector<16x32xf32>
    %c1_87 = arith.constant 1 : index
    %c0_88 = arith.constant 0 : index
    %c32 = arith.constant 32 : index
    %244 = vector.load %arg4[%c1_87, %c0_88, %c32] : memref<2x32x128xf32, #tpu.memory_space<vmem>>, vector<1x32x64xf32>
    %245 = vector.shape_cast %244 : vector<1x32x64xf32> to vector<32x64xf32>
    %cst_89 = arith.constant dense<0.000000e+00> : vector<16x64xf32>
    %246 = tpu.matmul %1, %245, %cst_89 {dimension_numbers = #tpu.dot_dimension_numbers<[1], [0], [0], [1], [0, 0, 1, 1], [], []>} : vector<16x32xf32>, vector<32x64xf32>, vector<16x64xf32> -> vector<16x64xf32>
    %247 = vector.extract_strided_slice %237 {offsets = [0, 32], sizes = [1, 64], strides = [1, 1]} : vector<1x128xf32> to vector<1x64xf32>
    %248 = vector.broadcast %247 : vector<1x64xf32> to vector<16x64xf32>
    %249 = arith.addf %246, %248 : vector<16x64xf32>
    %250 = vector.extract_strided_slice %249 {offsets = [0, 0], sizes = [16, 32], strides = [1, 1]} : vector<16x64xf32> to vector<16x32xf32>
    %251 = vector.extract_strided_slice %249 {offsets = [0, 32], sizes = [16, 32], strides = [1, 1]} : vector<16x64xf32> to vector<16x32xf32>
    %c1_90 = arith.constant 1 : index
    %c0_91 = arith.constant 0 : index
    %c96_92 = arith.constant 96 : index
    %252 = vector.load %arg4[%c1_90, %c0_91, %c96_92] : memref<2x32x128xf32, #tpu.memory_space<vmem>>, vector<1x32x32xf32>
    %253 = vector.shape_cast %252 : vector<1x32x32xf32> to vector<32x32xf32>
    %254 = vector.extract_strided_slice %237 {offsets = [0, 96], sizes = [1, 32], strides = [1, 1]} : vector<1x128xf32> to vector<1x32xf32>
    %c0_93 = arith.constant 0 : index
    %c0_94 = arith.constant 0 : index
    %c0_95 = arith.constant 0 : index
    %255 = vector.load %arg3[%c0_93, %c0_94, %c0_95] : memref<2x8x8xf32, #tpu.memory_space<vmem>>, vector<1x8x8xf32>
    %256 = vector.shape_cast %255 : vector<1x8x8xf32> to vector<8x8xf32>
    %cst_96 = arith.constant 0.000000e+00 : f32
    %257 = vector.broadcast %cst_96 : f32 to vector<8x32xf32>
    %258 = vector.extract_strided_slice %243 {offsets = [0, 0], sizes = [8, 8], strides = [1, 1]} : vector<16x32xf32> to vector<8x8xf32>
    %259 = vector.extract_strided_slice %250 {offsets = [0, 0], sizes = [8, 8], strides = [1, 1]} : vector<16x32xf32> to vector<8x8xf32>
    %260 = vector.extract_strided_slice %251 {offsets = [0, 0], sizes = [8, 8], strides = [1, 1]} : vector<16x32xf32> to vector<8x8xf32>
    %cst_97 = arith.constant dense<0.000000e+00> : vector<8x8xf32>
    %261 = tpu.matmul %258, %259, %cst_97 {dimension_numbers = #tpu.dot_dimension_numbers<[1], [1], [0], [0], [0, 0, 1, 0], [], []>} : vector<8x8xf32>, vector<8x8xf32>, vector<8x8xf32> -> vector<8x8xf32>
    %cst_98 = arith.constant 0.353553385 : f32
    %262 = vector.broadcast %cst_98 : f32 to vector<8x8xf32>
    %263 = arith.mulf %261, %262 : vector<8x8xf32>
    %264 = arith.addf %263, %256 : vector<8x8xf32>
    %cst_99 = arith.constant dense<0xFF800000> : vector<8xf32>
    %265 = vector.multi_reduction <maximumf>, %264, %cst_99 [1] : vector<8x8xf32> to vector<8xf32>
    %266 = vector.shape_cast %265 : vector<8xf32> to vector<8x1xf32>
    %267 = vector.broadcast %266 : vector<8x1xf32> to vector<8x8xf32>
    %268 = arith.subf %264, %267 : vector<8x8xf32>
    %269 = math.exp %268 : vector<8x8xf32>
    %cst_100 = arith.constant dense<0.000000e+00> : vector<8xf32>
    %270 = vector.multi_reduction <add>, %269, %cst_100 [1] : vector<8x8xf32> to vector<8xf32>
    %271 = vector.shape_cast %270 : vector<8xf32> to vector<8x1xf32>
    %272 = vector.broadcast %271 : vector<8x1xf32> to vector<8x8xf32>
    %273 = arith.divf %269, %272 : vector<8x8xf32>
    %cst_101 = arith.constant dense<0.000000e+00> : vector<8x8xf32>
    %274 = tpu.matmul %273, %260, %cst_101 {dimension_numbers = #tpu.dot_dimension_numbers<[1], [0], [0], [1], [0, 0, 1, 1], [], []>} : vector<8x8xf32>, vector<8x8xf32>, vector<8x8xf32> -> vector<8x8xf32>
    %275 = vector.extract_strided_slice %253 {offsets = [0, 0], sizes = [8, 32], strides = [1, 1]} : vector<32x32xf32> to vector<8x32xf32>
    %cst_102 = arith.constant dense<0.000000e+00> : vector<8x32xf32>
    %276 = tpu.matmul %274, %275, %cst_102 {dimension_numbers = #tpu.dot_dimension_numbers<[1], [0], [0], [1], [0, 0, 1, 1], [], []>} : vector<8x8xf32>, vector<8x32xf32>, vector<8x32xf32> -> vector<8x32xf32>
    %277 = arith.addf %257, %276 : vector<8x32xf32>
    %278 = vector.extract_strided_slice %243 {offsets = [0, 8], sizes = [8, 8], strides = [1, 1]} : vector<16x32xf32> to vector<8x8xf32>
    %279 = vector.extract_strided_slice %250 {offsets = [0, 8], sizes = [8, 8], strides = [1, 1]} : vector<16x32xf32> to vector<8x8xf32>
    %280 = vector.extract_strided_slice %251 {offsets = [0, 8], sizes = [8, 8], strides = [1, 1]} : vector<16x32xf32> to vector<8x8xf32>
    %cst_103 = arith.constant dense<0.000000e+00> : vector<8x8xf32>
    %281 = tpu.matmul %278, %279, %cst_103 {dimension_numbers = #tpu.dot_dimension_numbers<[1], [1], [0], [0], [0, 0, 1, 0], [], []>} : vector<8x8xf32>, vector<8x8xf32>, vector<8x8xf32> -> vector<8x8xf32>
    %cst_104 = arith.constant 0.353553385 : f32
    %282 = vector.broadcast %cst_104 : f32 to vector<8x8xf32>
    %283 = arith.mulf %281, %282 : vector<8x8xf32>
    %284 = arith.addf %283, %256 : vector<8x8xf32>
    %cst_105 = arith.constant dense<0xFF800000> : vector<8xf32>
    %285 = vector.multi_reduction <maximumf>, %284, %cst_105 [1] : vector<8x8xf32> to vector<8xf32>
    %286 = vector.shape_cast %285 : vector<8xf32> to vector<8x1xf32>
    %287 = vector.broadcast %286 : vector<8x1xf32> to vector<8x8xf32>
    %288 = arith.subf %284, %287 : vector<8x8xf32>
    %289 = math.exp %288 : vector<8x8xf32>
    %cst_106 = arith.constant dense<0.000000e+00> : vector<8xf32>
    %290 = vector.multi_reduction <add>, %289, %cst_106 [1] : vector<8x8xf32> to vector<8xf32>
    %291 = vector.shape_cast %290 : vector<8xf32> to vector<8x1xf32>
    %292 = vector.broadcast %291 : vector<8x1xf32> to vector<8x8xf32>
    %293 = arith.divf %289, %292 : vector<8x8xf32>
    %cst_107 = arith.constant dense<0.000000e+00> : vector<8x8xf32>
    %294 = tpu.matmul %293, %280, %cst_107 {dimension_numbers = #tpu.dot_dimension_numbers<[1], [0], [0], [1], [0, 0, 1, 1], [], []>} : vector<8x8xf32>, vector<8x8xf32>, vector<8x8xf32> -> vector<8x8xf32>
    %295 = vector.extract_strided_slice %253 {offsets = [8, 0], sizes = [8, 32], strides = [1, 1]} : vector<32x32xf32> to vector<8x32xf32>
    %cst_108 = arith.constant dense<0.000000e+00> : vector<8x32xf32>
    %296 = tpu.matmul %294, %295, %cst_108 {dimension_numbers = #tpu.dot_dimension_numbers<[1], [0], [0], [1], [0, 0, 1, 1], [], []>} : vector<8x8xf32>, vector<8x32xf32>, vector<8x32xf32> -> vector<8x32xf32>
    %297 = arith.addf %277, %296 : vector<8x32xf32>
    %298 = vector.extract_strided_slice %243 {offsets = [0, 16], sizes = [8, 8], strides = [1, 1]} : vector<16x32xf32> to vector<8x8xf32>
    %299 = vector.extract_strided_slice %250 {offsets = [0, 16], sizes = [8, 8], strides = [1, 1]} : vector<16x32xf32> to vector<8x8xf32>
    %300 = vector.extract_strided_slice %251 {offsets = [0, 16], sizes = [8, 8], strides = [1, 1]} : vector<16x32xf32> to vector<8x8xf32>
    %cst_109 = arith.constant dense<0.000000e+00> : vector<8x8xf32>
    %301 = tpu.matmul %298, %299, %cst_109 {dimension_numbers = #tpu.dot_dimension_numbers<[1], [1], [0], [0], [0, 0, 1, 0], [], []>} : vector<8x8xf32>, vector<8x8xf32>, vector<8x8xf32> -> vector<8x8xf32>
    %cst_110 = arith.constant 0.353553385 : f32
    %302 = vector.broadcast %cst_110 : f32 to vector<8x8xf32>
    %303 = arith.mulf %301, %302 : vector<8x8xf32>
    %304 = arith.addf %303, %256 : vector<8x8xf32>
    %cst_111 = arith.constant dense<0xFF800000> : vector<8xf32>
    %305 = vector.multi_reduction <maximumf>, %304, %cst_111 [1] : vector<8x8xf32> to vector<8xf32>
    %306 = vector.shape_cast %305 : vector<8xf32> to vector<8x1xf32>
    %307 = vector.broadcast %306 : vector<8x1xf32> to vector<8x8xf32>
    %308 = arith.subf %304, %307 : vector<8x8xf32>
    %309 = math.exp %308 : vector<8x8xf32>
    %cst_112 = arith.constant dense<0.000000e+00> : vector<8xf32>
    %310 = vector.multi_reduction <add>, %309, %cst_112 [1] : vector<8x8xf32> to vector<8xf32>
    %311 = vector.shape_cast %310 : vector<8xf32> to vector<8x1xf32>
    %312 = vector.broadcast %311 : vector<8x1xf32> to vector<8x8xf32>
    %313 = arith.divf %309, %312 : vector<8x8xf32>
    %cst_113 = arith.constant dense<0.000000e+00> : vector<8x8xf32>
    %314 = tpu.matmul %313, %300, %cst_113 {dimension_numbers = #tpu.dot_dimension_numbers<[1], [0], [0], [1], [0, 0, 1, 1], [], []>} : vector<8x8xf32>, vector<8x8xf32>, vector<8x8xf32> -> vector<8x8xf32>
    %315 = vector.extract_strided_slice %253 {offsets = [16, 0], sizes = [8, 32], strides = [1, 1]} : vector<32x32xf32> to vector<8x32xf32>
    %cst_114 = arith.constant dense<0.000000e+00> : vector<8x32xf32>
    %316 = tpu.matmul %314, %315, %cst_114 {dimension_numbers = #tpu.dot_dimension_numbers<[1], [0], [0], [1], [0, 0, 1, 1], [], []>} : vector<8x8xf32>, vector<8x32xf32>, vector<8x32xf32> -> vector<8x32xf32>
    %317 = arith.addf %297, %316 : vector<8x32xf32>
    %318 = vector.extract_strided_slice %243 {offsets = [0, 24], sizes = [8, 8], strides = [1, 1]} : vector<16x32xf32> to vector<8x8xf32>
    %319 = vector.extract_strided_slice %250 {offsets = [0, 24], sizes = [8, 8], strides = [1, 1]} : vector<16x32xf32> to vector<8x8xf32>
    %320 = vector.extract_strided_slice %251 {offsets = [0, 24], sizes = [8, 8], strides = [1, 1]} : vector<16x32xf32> to vector<8x8xf32>
    %cst_115 = arith.constant dense<0.000000e+00> : vector<8x8xf32>
    %321 = tpu.matmul %318, %319, %cst_115 {dimension_numbers = #tpu.dot_dimension_numbers<[1], [1], [0], [0], [0, 0, 1, 0], [], []>} : vector<8x8xf32>, vector<8x8xf32>, vector<8x8xf32> -> vector<8x8xf32>
    %cst_116 = arith.constant 0.353553385 : f32
    %322 = vector.broadcast %cst_116 : f32 to vector<8x8xf32>
    %323 = arith.mulf %321, %322 : vector<8x8xf32>
    %324 = arith.addf %323, %256 : vector<8x8xf32>
    %cst_117 = arith.constant dense<0xFF800000> : vector<8xf32>
    %325 = vector.multi_reduction <maximumf>, %324, %cst_117 [1] : vector<8x8xf32> to vector<8xf32>
    %326 = vector.shape_cast %325 : vector<8xf32> to vector<8x1xf32>
    %327 = vector.broadcast %326 : vector<8x1xf32> to vector<8x8xf32>
    %328 = arith.subf %324, %327 : vector<8x8xf32>
    %329 = math.exp %328 : vector<8x8xf32>
    %cst_118 = arith.constant dense<0.000000e+00> : vector<8xf32>
    %330 = vector.multi_reduction <add>, %329, %cst_118 [1] : vector<8x8xf32> to vector<8xf32>
    %331 = vector.shape_cast %330 : vector<8xf32> to vector<8x1xf32>
    %332 = vector.broadcast %331 : vector<8x1xf32> to vector<8x8xf32>
    %333 = arith.divf %329, %332 : vector<8x8xf32>
    %cst_119 = arith.constant dense<0.000000e+00> : vector<8x8xf32>
    %334 = tpu.matmul %333, %320, %cst_119 {dimension_numbers = #tpu.dot_dimension_numbers<[1], [0], [0], [1], [0, 0, 1, 1], [], []>} : vector<8x8xf32>, vector<8x8xf32>, vector<8x8xf32> -> vector<8x8xf32>
    %335 = vector.extract_strided_slice %253 {offsets = [24, 0], sizes = [8, 32], strides = [1, 1]} : vector<32x32xf32> to vector<8x32xf32>
    %cst_120 = arith.constant dense<0.000000e+00> : vector<8x32xf32>
    %336 = tpu.matmul %334, %335, %cst_120 {dimension_numbers = #tpu.dot_dimension_numbers<[1], [0], [0], [1], [0, 0, 1, 1], [], []>} : vector<8x8xf32>, vector<8x32xf32>, vector<8x32xf32> -> vector<8x32xf32>
    %337 = arith.addf %317, %336 : vector<8x32xf32>
    %338 = vector.broadcast %254 : vector<1x32xf32> to vector<8x32xf32>
    %339 = arith.addf %337, %338 : vector<8x32xf32>
    %c1_121 = arith.constant 1 : index
    %c0_122 = arith.constant 0 : index
    %c0_123 = arith.constant 0 : index
    %340 = vector.load %arg3[%c1_121, %c0_122, %c0_123] : memref<2x8x8xf32, #tpu.memory_space<vmem>>, vector<1x8x8xf32>
    %341 = vector.shape_cast %340 : vector<1x8x8xf32> to vector<8x8xf32>
    %cst_124 = arith.constant 0.000000e+00 : f32
    %342 = vector.broadcast %cst_124 : f32 to vector<8x32xf32>
    %343 = vector.extract_strided_slice %243 {offsets = [8, 0], sizes = [8, 8], strides = [1, 1]} : vector<16x32xf32> to vector<8x8xf32>
    %344 = vector.extract_strided_slice %250 {offsets = [8, 0], sizes = [8, 8], strides = [1, 1]} : vector<16x32xf32> to vector<8x8xf32>
    %345 = vector.extract_strided_slice %251 {offsets = [8, 0], sizes = [8, 8], strides = [1, 1]} : vector<16x32xf32> to vector<8x8xf32>
    %cst_125 = arith.constant dense<0.000000e+00> : vector<8x8xf32>
    %346 = tpu.matmul %343, %344, %cst_125 {dimension_numbers = #tpu.dot_dimension_numbers<[1], [1], [0], [0], [0, 0, 1, 0], [], []>} : vector<8x8xf32>, vector<8x8xf32>, vector<8x8xf32> -> vector<8x8xf32>
    %cst_126 = arith.constant 0.353553385 : f32
    %347 = vector.broadcast %cst_126 : f32 to vector<8x8xf32>
    %348 = arith.mulf %346, %347 : vector<8x8xf32>
    %349 = arith.addf %348, %341 : vector<8x8xf32>
    %cst_127 = arith.constant dense<0xFF800000> : vector<8xf32>
    %350 = vector.multi_reduction <maximumf>, %349, %cst_127 [1] : vector<8x8xf32> to vector<8xf32>
    %351 = vector.shape_cast %350 : vector<8xf32> to vector<8x1xf32>
    %352 = vector.broadcast %351 : vector<8x1xf32> to vector<8x8xf32>
    %353 = arith.subf %349, %352 : vector<8x8xf32>
    %354 = math.exp %353 : vector<8x8xf32>
    %cst_128 = arith.constant dense<0.000000e+00> : vector<8xf32>
    %355 = vector.multi_reduction <add>, %354, %cst_128 [1] : vector<8x8xf32> to vector<8xf32>
    %356 = vector.shape_cast %355 : vector<8xf32> to vector<8x1xf32>
    %357 = vector.broadcast %356 : vector<8x1xf32> to vector<8x8xf32>
    %358 = arith.divf %354, %357 : vector<8x8xf32>
    %cst_129 = arith.constant dense<0.000000e+00> : vector<8x8xf32>
    %359 = tpu.matmul %358, %345, %cst_129 {dimension_numbers = #tpu.dot_dimension_numbers<[1], [0], [0], [1], [0, 0, 1, 1], [], []>} : vector<8x8xf32>, vector<8x8xf32>, vector<8x8xf32> -> vector<8x8xf32>
    %360 = vector.extract_strided_slice %253 {offsets = [0, 0], sizes = [8, 32], strides = [1, 1]} : vector<32x32xf32> to vector<8x32xf32>
    %cst_130 = arith.constant dense<0.000000e+00> : vector<8x32xf32>
    %361 = tpu.matmul %359, %360, %cst_130 {dimension_numbers = #tpu.dot_dimension_numbers<[1], [0], [0], [1], [0, 0, 1, 1], [], []>} : vector<8x8xf32>, vector<8x32xf32>, vector<8x32xf32> -> vector<8x32xf32>
    %362 = arith.addf %342, %361 : vector<8x32xf32>
    %363 = vector.extract_strided_slice %243 {offsets = [8, 8], sizes = [8, 8], strides = [1, 1]} : vector<16x32xf32> to vector<8x8xf32>
    %364 = vector.extract_strided_slice %250 {offsets = [8, 8], sizes = [8, 8], strides = [1, 1]} : vector<16x32xf32> to vector<8x8xf32>
    %365 = vector.extract_strided_slice %251 {offsets = [8, 8], sizes = [8, 8], strides = [1, 1]} : vector<16x32xf32> to vector<8x8xf32>
    %cst_131 = arith.constant dense<0.000000e+00> : vector<8x8xf32>
    %366 = tpu.matmul %363, %364, %cst_131 {dimension_numbers = #tpu.dot_dimension_numbers<[1], [1], [0], [0], [0, 0, 1, 0], [], []>} : vector<8x8xf32>, vector<8x8xf32>, vector<8x8xf32> -> vector<8x8xf32>
    %cst_132 = arith.constant 0.353553385 : f32
    %367 = vector.broadcast %cst_132 : f32 to vector<8x8xf32>
    %368 = arith.mulf %366, %367 : vector<8x8xf32>
    %369 = arith.addf %368, %341 : vector<8x8xf32>
    %cst_133 = arith.constant dense<0xFF800000> : vector<8xf32>
    %370 = vector.multi_reduction <maximumf>, %369, %cst_133 [1] : vector<8x8xf32> to vector<8xf32>
    %371 = vector.shape_cast %370 : vector<8xf32> to vector<8x1xf32>
    %372 = vector.broadcast %371 : vector<8x1xf32> to vector<8x8xf32>
    %373 = arith.subf %369, %372 : vector<8x8xf32>
    %374 = math.exp %373 : vector<8x8xf32>
    %cst_134 = arith.constant dense<0.000000e+00> : vector<8xf32>
    %375 = vector.multi_reduction <add>, %374, %cst_134 [1] : vector<8x8xf32> to vector<8xf32>
    %376 = vector.shape_cast %375 : vector<8xf32> to vector<8x1xf32>
    %377 = vector.broadcast %376 : vector<8x1xf32> to vector<8x8xf32>
    %378 = arith.divf %374, %377 : vector<8x8xf32>
    %cst_135 = arith.constant dense<0.000000e+00> : vector<8x8xf32>
    %379 = tpu.matmul %378, %365, %cst_135 {dimension_numbers = #tpu.dot_dimension_numbers<[1], [0], [0], [1], [0, 0, 1, 1], [], []>} : vector<8x8xf32>, vector<8x8xf32>, vector<8x8xf32> -> vector<8x8xf32>
    %380 = vector.extract_strided_slice %253 {offsets = [8, 0], sizes = [8, 32], strides = [1, 1]} : vector<32x32xf32> to vector<8x32xf32>
    %cst_136 = arith.constant dense<0.000000e+00> : vector<8x32xf32>
    %381 = tpu.matmul %379, %380, %cst_136 {dimension_numbers = #tpu.dot_dimension_numbers<[1], [0], [0], [1], [0, 0, 1, 1], [], []>} : vector<8x8xf32>, vector<8x32xf32>, vector<8x32xf32> -> vector<8x32xf32>
    %382 = arith.addf %362, %381 : vector<8x32xf32>
    %383 = vector.extract_strided_slice %243 {offsets = [8, 16], sizes = [8, 8], strides = [1, 1]} : vector<16x32xf32> to vector<8x8xf32>
    %384 = vector.extract_strided_slice %250 {offsets = [8, 16], sizes = [8, 8], strides = [1, 1]} : vector<16x32xf32> to vector<8x8xf32>
    %385 = vector.extract_strided_slice %251 {offsets = [8, 16], sizes = [8, 8], strides = [1, 1]} : vector<16x32xf32> to vector<8x8xf32>
    %cst_137 = arith.constant dense<0.000000e+00> : vector<8x8xf32>
    %386 = tpu.matmul %383, %384, %cst_137 {dimension_numbers = #tpu.dot_dimension_numbers<[1], [1], [0], [0], [0, 0, 1, 0], [], []>} : vector<8x8xf32>, vector<8x8xf32>, vector<8x8xf32> -> vector<8x8xf32>
    %cst_138 = arith.constant 0.353553385 : f32
    %387 = vector.broadcast %cst_138 : f32 to vector<8x8xf32>
    %388 = arith.mulf %386, %387 : vector<8x8xf32>
    %389 = arith.addf %388, %341 : vector<8x8xf32>
    %cst_139 = arith.constant dense<0xFF800000> : vector<8xf32>
    %390 = vector.multi_reduction <maximumf>, %389, %cst_139 [1] : vector<8x8xf32> to vector<8xf32>
    %391 = vector.shape_cast %390 : vector<8xf32> to vector<8x1xf32>
    %392 = vector.broadcast %391 : vector<8x1xf32> to vector<8x8xf32>
    %393 = arith.subf %389, %392 : vector<8x8xf32>
    %394 = math.exp %393 : vector<8x8xf32>
    %cst_140 = arith.constant dense<0.000000e+00> : vector<8xf32>
    %395 = vector.multi_reduction <add>, %394, %cst_140 [1] : vector<8x8xf32> to vector<8xf32>
    %396 = vector.shape_cast %395 : vector<8xf32> to vector<8x1xf32>
    %397 = vector.broadcast %396 : vector<8x1xf32> to vector<8x8xf32>
    %398 = arith.divf %394, %397 : vector<8x8xf32>
    %cst_141 = arith.constant dense<0.000000e+00> : vector<8x8xf32>
    %399 = tpu.matmul %398, %385, %cst_141 {dimension_numbers = #tpu.dot_dimension_numbers<[1], [0], [0], [1], [0, 0, 1, 1], [], []>} : vector<8x8xf32>, vector<8x8xf32>, vector<8x8xf32> -> vector<8x8xf32>
    %400 = vector.extract_strided_slice %253 {offsets = [16, 0], sizes = [8, 32], strides = [1, 1]} : vector<32x32xf32> to vector<8x32xf32>
    %cst_142 = arith.constant dense<0.000000e+00> : vector<8x32xf32>
    %401 = tpu.matmul %399, %400, %cst_142 {dimension_numbers = #tpu.dot_dimension_numbers<[1], [0], [0], [1], [0, 0, 1, 1], [], []>} : vector<8x8xf32>, vector<8x32xf32>, vector<8x32xf32> -> vector<8x32xf32>
    %402 = arith.addf %382, %401 : vector<8x32xf32>
    %403 = vector.extract_strided_slice %243 {offsets = [8, 24], sizes = [8, 8], strides = [1, 1]} : vector<16x32xf32> to vector<8x8xf32>
    %404 = vector.extract_strided_slice %250 {offsets = [8, 24], sizes = [8, 8], strides = [1, 1]} : vector<16x32xf32> to vector<8x8xf32>
    %405 = vector.extract_strided_slice %251 {offsets = [8, 24], sizes = [8, 8], strides = [1, 1]} : vector<16x32xf32> to vector<8x8xf32>
    %cst_143 = arith.constant dense<0.000000e+00> : vector<8x8xf32>
    %406 = tpu.matmul %403, %404, %cst_143 {dimension_numbers = #tpu.dot_dimension_numbers<[1], [1], [0], [0], [0, 0, 1, 0], [], []>} : vector<8x8xf32>, vector<8x8xf32>, vector<8x8xf32> -> vector<8x8xf32>
    %cst_144 = arith.constant 0.353553385 : f32
    %407 = vector.broadcast %cst_144 : f32 to vector<8x8xf32>
    %408 = arith.mulf %406, %407 : vector<8x8xf32>
    %409 = arith.addf %408, %341 : vector<8x8xf32>
    %cst_145 = arith.constant dense<0xFF800000> : vector<8xf32>
    %410 = vector.multi_reduction <maximumf>, %409, %cst_145 [1] : vector<8x8xf32> to vector<8xf32>
    %411 = vector.shape_cast %410 : vector<8xf32> to vector<8x1xf32>
    %412 = vector.broadcast %411 : vector<8x1xf32> to vector<8x8xf32>
    %413 = arith.subf %409, %412 : vector<8x8xf32>
    %414 = math.exp %413 : vector<8x8xf32>
    %cst_146 = arith.constant dense<0.000000e+00> : vector<8xf32>
    %415 = vector.multi_reduction <add>, %414, %cst_146 [1] : vector<8x8xf32> to vector<8xf32>
    %416 = vector.shape_cast %415 : vector<8xf32> to vector<8x1xf32>
    %417 = vector.broadcast %416 : vector<8x1xf32> to vector<8x8xf32>
    %418 = arith.divf %414, %417 : vector<8x8xf32>
    %cst_147 = arith.constant dense<0.000000e+00> : vector<8x8xf32>
    %419 = tpu.matmul %418, %405, %cst_147 {dimension_numbers = #tpu.dot_dimension_numbers<[1], [0], [0], [1], [0, 0, 1, 1], [], []>} : vector<8x8xf32>, vector<8x8xf32>, vector<8x8xf32> -> vector<8x8xf32>
    %420 = vector.extract_strided_slice %253 {offsets = [24, 0], sizes = [8, 32], strides = [1, 1]} : vector<32x32xf32> to vector<8x32xf32>
    %cst_148 = arith.constant dense<0.000000e+00> : vector<8x32xf32>
    %421 = tpu.matmul %419, %420, %cst_148 {dimension_numbers = #tpu.dot_dimension_numbers<[1], [0], [0], [1], [0, 0, 1, 1], [], []>} : vector<8x8xf32>, vector<8x32xf32>, vector<8x32xf32> -> vector<8x32xf32>
    %422 = arith.addf %402, %421 : vector<8x32xf32>
    %423 = vector.broadcast %254 : vector<1x32xf32> to vector<8x32xf32>
    %424 = arith.addf %422, %423 : vector<8x32xf32>
    %425 = tpu.concatenate %339, %424 in 0 : vector<8x32xf32>, vector<8x32xf32> -> vector<16x32xf32>
    %426 = arith.addf %211, %425 : vector<16x32xf32>
    %c100 = arith.constant 100 : index
    %c0_149 = arith.constant 0 : index
    %427 = vector.load %arg6[%c100, %c0_149] : memref<104x64xf32, #tpu.memory_space<vmem>>, vector<1x32xf32>
    %c103 = arith.constant 103 : index
    %c0_150 = arith.constant 0 : index
    %428 = vector.load %arg6[%c103, %c0_150] : memref<104x64xf32, #tpu.memory_space<vmem>>, vector<1x32xf32>
    %cst_151 = arith.constant dense<0.000000e+00> : vector<16xf32>
    %429 = vector.multi_reduction <add>, %426, %cst_151 [1] : vector<16x32xf32> to vector<16xf32>
    %430 = vector.shape_cast %429 : vector<16xf32> to vector<16x1xf32>
    %cst_152 = arith.constant 3.200000e+01 : f32
    %431 = vector.broadcast %cst_152 : f32 to vector<16x1xf32>
    %432 = arith.divf %430, %431 : vector<16x1xf32>
    %433 = vector.broadcast %432 : vector<16x1xf32> to vector<16x32xf32>
    %434 = arith.subf %426, %433 : vector<16x32xf32>
    %435 = arith.mulf %434, %434 : vector<16x32xf32>
    %cst_153 = arith.constant dense<0.000000e+00> : vector<16xf32>
    %436 = vector.multi_reduction <add>, %435, %cst_153 [1] : vector<16x32xf32> to vector<16xf32>
    %437 = vector.shape_cast %436 : vector<16xf32> to vector<16x1xf32>
    %cst_154 = arith.constant 0.0322580636 : f32
    %438 = vector.broadcast %cst_154 : f32 to vector<16x1xf32>
    %439 = arith.mulf %437, %438 : vector<16x1xf32>
    %440 = vector.broadcast %432 : vector<16x1xf32> to vector<16x32xf32>
    %441 = arith.subf %426, %440 : vector<16x32xf32>
    %442 = vector.broadcast %427 : vector<1x32xf32> to vector<16x32xf32>
    %443 = arith.mulf %442, %441 : vector<16x32xf32>
    %444 = math.sqrt %439 : vector<16x1xf32>
    %cst_155 = arith.constant 9.99999997E-7 : f32
    %445 = vector.broadcast %cst_155 : f32 to vector<16x1xf32>
    %446 = arith.addf %444, %445 : vector<16x1xf32>
    %447 = vector.broadcast %446 : vector<16x1xf32> to vector<16x32xf32>
    %448 = arith.divf %443, %447 : vector<16x32xf32>
    %449 = vector.broadcast %428 : vector<1x32xf32> to vector<16x32xf32>
    %450 = arith.addf %448, %449 : vector<16x32xf32>
    %c0_156 = arith.constant 0 : index
    %c0_157 = arith.constant 0 : index
    %451 = vector.load %arg6[%c0_156, %c0_157] : memref<104x64xf32, #tpu.memory_space<vmem>>, vector<32x64xf32>
    %c96_158 = arith.constant 96 : index
    %c0_159 = arith.constant 0 : index
    %452 = vector.load %arg6[%c96_158, %c0_159] : memref<104x64xf32, #tpu.memory_space<vmem>>, vector<1x64xf32>
    %c32_160 = arith.constant 32 : index
    %c0_161 = arith.constant 0 : index
    %453 = vector.load %arg6[%c32_160, %c0_161] : memref<104x64xf32, #tpu.memory_space<vmem>>, vector<64x32xf32>
    %c97 = arith.constant 97 : index
    %c0_162 = arith.constant 0 : index
    %454 = vector.load %arg6[%c97, %c0_162] : memref<104x64xf32, #tpu.memory_space<vmem>>, vector<1x32xf32>
    %cst_163 = arith.constant dense<0.000000e+00> : vector<16x64xf32>
    %455 = tpu.matmul %450, %451, %cst_163 {dimension_numbers = #tpu.dot_dimension_numbers<[1], [0], [0], [1], [0, 0, 1, 1], [], []>} : vector<16x32xf32>, vector<32x64xf32>, vector<16x64xf32> -> vector<16x64xf32>
    %456 = vector.broadcast %452 : vector<1x64xf32> to vector<16x64xf32>
    %457 = arith.addf %455, %456 : vector<16x64xf32>
    %cst_164 = arith.constant 0.000000e+00 : f32
    %458 = vector.broadcast %cst_164 : f32 to vector<16x64xf32>
    %459 = arith.maximumf %457, %458 : vector<16x64xf32>
    %cst_165 = arith.constant dense<0.000000e+00> : vector<16x32xf32>
    %460 = tpu.matmul %459, %453, %cst_165 {dimension_numbers = #tpu.dot_dimension_numbers<[1], [0], [0], [1], [0, 0, 1, 1], [], []>} : vector<16x64xf32>, vector<64x32xf32>, vector<16x32xf32> -> vector<16x32xf32>
    %461 = vector.broadcast %454 : vector<1x32xf32> to vector<16x32xf32>
    %462 = arith.addf %460, %461 : vector<16x32xf32>
    %463 = arith.addf %426, %462 : vector<16x32xf32>
    %c0_166 = arith.constant 0 : index
    %c0_167 = arith.constant 0 : index
    %464 = vector.load %arg7[%c0_166, %c0_167] : memref<16x32xf32, #tpu.memory_space<vmem>>, vector<16x32xf32>
    tpu.vector_store %arg7[%c0_166, %c0_167], %463 {strides = array<i32>} : memref<16x32xf32, #tpu.memory_space<vmem>>, vector<16x32xf32>,
    return
  }
}

</mosaic_0001>

<bundles_post_ra>
// kernel: tpu_custom_call.1
= control target key start
LH: loop header
LB: loop body
LE: loop exit
PB: predicated region body
PF: predicated region fallthrough
CT: control target
= control target key end

     0   :  { %vm33_vm0 = vcmask 261120   ;;  %s6010_s0 = inlined_call_operand.vmem [shape: f32[16,32], index: 0, kind: input, shape index: {}]   ;;  %s6011_s1 = inlined_call_operand.vmem [shape: f32[16,32], index: 1, kind: input, shape index: {}]   ;;  %s6012_s2 = inlined_call_operand.vmem [shape: f32[2,8,8], index: 2, kind: input, shape index: {}]   ;;  %s6013_s3 = inlined_call_operand.vmem [shape: f32[2,8,8], index: 3, kind: input, shape index: {}]   ;;  %s6014_s4 = inlined_call_operand.vmem [shape: f32[2,32,128], index: 4, kind: input, shape index: {}]   ;;  %s6015_s5 = inlined_call_operand.vmem [shape: f32[2,1,128], index: 5, kind: input, shape index: {}]   ;;  %s6016_s6 = inlined_call_operand.vmem [shape: f32[104,64], index: 6, kind: input, shape index: {}]   ;;  %s6017_s7 = inlined_call_operand.hbm [shape: f32[16,32], index: 7, kind: output, shape index: {}]  }
   0x1   :  { %v5350_v0 = vld [vmem:[%s6010_s0] sm:$0xff]  ;;  %v5355_v1 = vld [vmem:[%s6010_s0 + $0x8] sm:$0xff] }
   0x2   :  { %12 = vsyncpa [#allocation3], 0  ;;  %v34_v2 = vsel %vm33_vm0, %v5350_v0, 0.0  ;;  %v37_v3 = vsel %vm33_vm0, %v5355_v1, 0.0  ;;  %v5368_v14 = vld [vmem:[%s6014_s4] sm:$0xff]  ;;  %v5373_v15 = vld [vmem:[%s6014_s4 + $0x8] sm:$0xff] }
   0x3   :  { %35 = vadd.xlane.f32.xlu0 %v34_v2  ;;  %v5378_v16 = vld [vmem:[%s6014_s4 + $0x10] sm:$0xff]  ;;  %v5103_v17 = vpack.c.bf16 %v5373_v15, %v5368_v14  ;;  %v5385_v18 = vld [vmem:[%s6014_s4 + $0x18] sm:$0xff]  ;;  %v4579_v36 = vld [vmem:[%s6016_s6 + $0x62] ss:$0 sm:$0xff]  ;;  %v5290_v46 = vmov 0.0   ;;  %vm5291_vm5 = vmmov 0  }
   0x4   :  { %v5107_v19 = vpack.c.bf16 %v5385_v18, %v5378_v16  ;;  %v4580_v39 = vld [vmem:[%s6016_s6 + $0x65] ss:$0 sm:$0xff]  ;;  %4816 = vmatprep.subr.mxu1 %v5290_v46  ;;  %4818 = vmatprep.mubr.msk.f32.mxu1 %vm5291_vm5, %v5290_v46  ;;  %v5406_v47 = vld [vmem:[%s6015_s5] ss:$0 sm:$0xff]  ;;  %s5292_s18 = smov 88   ;;  %s5293_s19 = smov 96  }
   0x5   :  { %5104 = vmatprep.subr.bf16.mxu0 %v5103_v17  ;;  %s5294_s20 = smov 120   ;;  %vm183_vm6 = vcmask 64512   ;;  %v5433_v55 = vld [vmem:[%s6012_s2] sm:$0xff]  ;;  %s5295_s23 = smov 64   ;;  %vm4477_vm15 = vcmask 523264  }
   0x6   :  { %5106 = vmatpush3.bf16.msra.mxu0 %v5103_v17  ;;  %s5296_s24 = smov 32   ;;  %s5297_s25 = smov 80  }
   0x7   :  { %38 = vadd.xlane.f32.xlu0 %v37_v3  ;;  %5108 = vmatprep.subr.bf16.mxu0 %v5107_v19  ;;  %s5298_s26 = smov 112   ;;  %s5299_s27 = smov 48  }
   0x8   :  { %s5300_s0 = smov 56   ;;  %s5301_s28 = smov 72  }
   0x9   :  { %s5302_s29 = smov 104   ;;  %s5303_s30 = smov 40  }
   0xa   :  { %5110 = vmatpush3.bf16.msra.mxu0 %v5107_v19 }
   0xb   :  { %4811 = vmatprep.subr.mxu0 %v5290_v46 }
  0x90   :  { %v36_v4 = vpop.xlane.xlu0 %35 }
  0x91   :  { %v41_v5 = vmul.f32 0.03125, %v36_v4 }
  0x93   :  { %v43_v6 = vsub.f32 %v5350_v0, %v41_v5 }
  0x94   :  { %v39_v7 = vpop.xlane.xlu0 %38 }
  0x95   :  { %v42_v8 = vmul.f32 0.03125, %v39_v7  ;;  %v45_v9 = vmul.f32 %v43_v6, %v43_v6  ;;  %v59_v37 = vmul.f32 %v4579_v36, %v43_v6 }
  0x97   :  { %v44_v10 = vsub.f32 %v5355_v1, %v42_v8  ;;  %v47_v11 = vsel %vm33_vm0, %v45_v9, 0.0 }
  0x98   :  { %48 = vadd.xlane.f32.xlu1 %v47_v11 }
  0x99   :  { %v46_v12 = vmul.f32 %v44_v10, %v44_v10  ;;  %v60_v41 = vmul.f32 %v4579_v36, %v44_v10 }
  0x9b   :  { %v50_v13 = vsel %vm33_vm0, %v46_v12, 0.0 }
  0x9c   :  { %51 = vadd.xlane.f32.xlu1 %v50_v13 }
 0x125   :  { %v49_v20 = vpop.xlane.xlu1 %48 }
 0x126   :  { %v53_v21 = vmul.f32 0.032258064, %v49_v20 }
 0x128   :  { %5178 = vrsqrt.f32 %v53_v21  ;;  %vm63_vm1 = vcmp.eq.f32.partialorder %v53_v21, inf  ;;  %v66_v26 = vand.u32 2147483648, %v53_v21  ;;  %vm65_vm2 = vcmp.eq.f32.partialorder %v53_v21, 0.0 }
 0x129   :  { %v52_v22 = vpop.xlane.xlu1 %51 }
 0x12a   :  { %v54_v23 = vmul.f32 0.032258064, %v52_v22 }
 0x12c   :  { %5180 = vrsqrt.f32 %v54_v23  ;;  %vm70_vm3 = vcmp.eq.f32.partialorder %v54_v23, inf  ;;  %v73_v32 = vand.u32 2147483648, %v54_v23  ;;  %vm72_vm4 = vcmp.eq.f32.partialorder %v54_v23, 0.0 }
 0x132   :  { %v5179_v24 = vpop.eup %5178 }
 0x133   :  { %v62_v25 = vmul.f32 %v5179_v24, %v53_v21 }
 0x135   :  { %v64_v27 = vsel %vm63_vm1, %v53_v21, %v62_v25 }
 0x136   :  { %v5181_v28 = vpop.eup %5180  ;;  %v67_v29 = vsel %vm65_vm2, %v66_v26, %v64_v27 }
 0x137   :  { %v69_v30 = vmul.f32 %v5181_v28, %v54_v23  ;;  %v75_v31 = vadd.f32 1e-06, %v67_v29 }
 0x139   :  { %v71_v33 = vsel %vm70_vm3, %v54_v23, %v69_v30  ;;  %5182 = vrcp.f32 %v75_v31 }
 0x13a   :  { %v74_v34 = vsel %vm72_vm4, %v73_v32, %v71_v33 }
 0x13b   :  { %v76_v35 = vadd.f32 1e-06, %v74_v34 }
 0x13d   :  { %5184 = vrcp.f32 %v76_v35 }
 0x143   :  { %v5183_v38 = vpop.eup %5182 }
 0x144   :  { %v78_v40 = vmul.f32 %v5183_v38, %v59_v37 }
 0x146   :  { %v85_v42 = vadd.f32 %v4580_v39, %v78_v40 }
 0x147   :  { %v5185_v43 = vpop.eup %5184 }
 0x148   :  { %v80_v44 = vmul.f32 %v5185_v43, %v60_v41  ;;  %4808 = vmatprep.mubr.msk.f32.mxu0 %vm33_vm0, %v85_v42 }
 0x14a   :  { %v86_v45 = vadd.f32 %v4580_v39, %v80_v44 }
 0x14c   :  { %4809 = vmatmul.mubr.msk.f32.vlgmr.msra.gmra.mrb[0].mxu0 %vm33_vm0, %v86_v45 }
 0x14d   :  { %4813 = vmatprep.mubr.msk.f32.mxu0 %vm5291_vm5, %v5290_v46 }
 0x21f   :  { %v5408_v48 = vpop.f32.mrb[0].mxu0 }
 0x220   :  { %v170_v49 = vpop.f32.mrb[1].mxu0 }
 0x221   :  { %v5411_v50 = vadd.f32 %v5406_v47, %v170_v49 }
 0x223   :  { %349 = vrot.lane.b32.xlu1 %v5411_v50, %s5292_s18  ;;  %181 = vrot.lane.b32.xlu0 %v5411_v50, %s5293_s19 }
 0x227   :  { %347 = vrot.lane.b32.xlu1 %v5411_v50, %s5294_s20 }
 0x295   :  { %v182_v51 = vpop.permute.xlu0 %181  ;;  %v350_v52 = vpop.permute.xlu1 %349 }
 0x296   :  { %4812 = vmatpush3.xpose.msk.msra.mxu0 %vm183_vm6, %v182_v51 }
 0x297   :  { %4821 = vmatprep.subr.mxu0 %v5290_v46 }
 0x299   :  { %4814 = vmatmul.mubr.msk.f32.vlgmr.msra.gmra.mrb[2].mxu0 %vm183_vm6, %v5411_v50  ;;  %v348_v53 = vpop.permute.xlu1 %347 }
 0x29a   :  { %4822 = vmatpush3.xpose.msk.msra.mxu0 %vm183_vm6, %v350_v52  ;;  %4823 = vmatprep.mubr.msk.f32.mxu0 %vm5291_vm5, %v5290_v46 }
 0x29b   :  { %4831 = vmatprep.subr.mxu0 %v5290_v46 }
 0x29d   :  { %4824 = vmatmul.mubr.msk.f32.vlgmr.msra.gmra.mrb[4].mxu0 %vm183_vm6, %v348_v53 }
 0x29e   :  { %4833 = vmatprep.mubr.msk.f32.mxu0 %vm5291_vm5, %v5290_v46 }
 0x36c   :  { %v254_v54 = vpop.f32.mrb[2].mxu0 }
 0x36d   :  { %v258_v56 = vmul.f32 0.35355338, %v254_v54  ;;  %v4815_v57 = vpop.f32.mrb[3].mxu0 }
 0x36f   :  { %v259_v58 = vadd.f32 %v258_v56, %v5433_v55 }
 0x370   :  { %v421_v59 = vpop.f32.mrb[4].mxu0 }
 0x371   :  { %v425_v60 = vmul.f32 0.35355338, %v421_v59  ;;  %v4825_v61 = vpop.f32.mrb[5].mxu0  ;;  %v260_v62 = vsel %vm183_vm6, %v259_v58, -inf }
 0x372   :  { %261 = vmax.xlane.f32.xlu1 %v260_v62 }
 0x373   :  { %v426_v63 = vadd.f32 %v425_v60, %v5433_v55 }
 0x375   :  { %v427_v2 = vsel %vm183_vm6, %v426_v63, -inf }
 0x376   :  { %428 = vmax.xlane.f32.xlu0 %v427_v2 }
 0x383   :  { %271 = vrot.lane.b32.xlu1 %v5411_v50, %s5295_s23 }
 0x387   :  { %515 = vrot.lane.b32.xlu1 %v5373_v15, %s5296_s24 }
 0x38b   :  { %670 = vrot.lane.b32.xlu1 %v5411_v50, %s5297_s25 }
 0x38f   :  { %668 = vrot.lane.b32.xlu1 %v5411_v50, %s5298_s26 }
 0x393   :  { %759 = vrot.lane.b32.xlu1 %v5411_v50, %s5299_s27 }
 0x3ff   :  { %v262_v3 = vpop.xlane.xlu1 %261 }
 0x400   :  { %v263_v4 = vsub.f32 %v259_v58, %v262_v3 }
 0x402   :  { %v264_v5 = vmul.f32 1.442695, %v263_v4 }
 0x403   :  { %v272_v6 = vpop.permute.xlu1 %271  ;;  %v429_v7 = vpop.xlane.xlu0 %428 }
 0x404   :  { %5186 = vpow2.f32 %v264_v5  ;;  %v430_v8 = vsub.f32 %v426_v63, %v429_v7  ;;  %4817 = vmatpush3.msra.mxu1 %v272_v6  ;;  %v5506_v63 = vadd.f32 %v5408_v48, %v5406_v47 }
 0x405   :  { %4826 = vmatprep.subr.mxu1 %v5290_v46 }
 0x406   :  { %v431_v9 = vmul.f32 1.442695, %v430_v8 }
 0x407   :  { %v5450_v10 = vpop.permute.xlu1 %515 }
 0x408   :  { %5188 = vpow2.f32 %v431_v9  ;;  %4832 = vmatpush3.msra.mxu0 %v5450_v10 }
 0x409   :  { %4841 = vmatprep.subr.mxu0 %v5290_v46 }
 0x40b   :  { %v671_v27 = vpop.permute.xlu1 %670 }
 0x40e   :  { %v5187_v11 = vpop.eup %5186 }
 0x40f   :  { %v266_v12 = vsel %vm183_vm6, %v5187_v11, 0.0  ;;  %v669_v30 = vpop.permute.xlu1 %668 }
 0x410   :  { %267 = vadd.xlane.f32.xlu0 %v266_v12 }
 0x412   :  { %v5189_v13 = vpop.eup %5188 }
 0x413   :  { %v433_v15 = vsel %vm183_vm6, %v5189_v13, 0.0  ;;  %v760_v42 = vpop.permute.xlu1 %759 }
 0x414   :  { %434 = vadd.xlane.f32.xlu0 %v433_v15 }
 0x42a   :  { %438 = vrot.lane.b32.xlu0 %v5411_v50, %s5300_s0 }
 0x49d   :  { %v268_v17 = vpop.xlane.xlu0 %267 }
 0x49e   :  { %5190 = vrcp.f32 %v268_v17 }
 0x4a1   :  { %v435_v19 = vpop.xlane.xlu0 %434 }
 0x4a2   :  { %5192 = vrcp.f32 %v435_v19 }
 0x4a5   :  { %v439_v22 = vpop.permute.xlu0 %438 }
 0x4a8   :  { %v5191_v20 = vpop.eup %5190 }
 0x4a9   :  { %v270_v21 = vmul.f32 %v5191_v20, %v5187_v11 }
 0x4ab   :  { %4819 = vmatmul.mubr.msk.f32.vlgmr.msra.gmra.mrb[0].mxu1 %vm183_vm6, %v270_v21 }
 0x4ac   :  { %v5193_v23 = vpop.eup %5192  ;;  %4827 = vmatpush3.msra.mxu1 %v439_v22  ;;  %4828 = vmatprep.mubr.msk.f32.mxu1 %vm5291_vm5, %v5290_v46  ;;  %v5542_v22 = vld [vmem:[%s6012_s2 + $0x8] sm:$0xff] }
 0x4ad   :  { %v437_v24 = vmul.f32 %v5193_v23, %v5189_v13  ;;  %4836 = vmatprep.subr.mxu1 %v5290_v46 }
 0x4af   :  { %4829 = vmatmul.mubr.msk.f32.vlgmr.msra.gmra.mrb[2].mxu1 %vm183_vm6, %v437_v24 }
 0x4b0   :  { %4838 = vmatprep.mubr.msk.f32.mxu1 %vm5291_vm5, %v5290_v46 }
 0x57e   :  { %v343_v25 = vpop.f32.mrb[0].mxu1 }
 0x57f   :  { %v4820_v26 = vpop.f32.mrb[1].mxu1 }
 0x582   :  { %v510_v28 = vpop.f32.mrb[2].mxu1 }
 0x583   :  { %v4830_v29 = vpop.f32.mrb[3].mxu1  ;;  %4834 = vmatmul.mubr.msk.f32.vlgmr.msra.gmra.mrb[6].mxu0 %vm183_vm6, %v510_v28 }
 0x584   :  { %4842 = vmatpush3.xpose.msk.msra.mxu0 %vm183_vm6, %v671_v27  ;;  %4843 = vmatprep.mubr.msk.f32.mxu0 %vm5291_vm5, %v5290_v46 }
 0x585   :  { %4851 = vmatprep.subr.mxu0 %v5290_v46 }
 0x587   :  { %4844 = vmatmul.mubr.msk.f32.vlgmr.msra.gmra.mrb[8].mxu0 %vm183_vm6, %v669_v30 }
 0x588   :  { %4853 = vmatprep.mubr.msk.f32.mxu0 %vm5291_vm5, %v5290_v46 }
 0x656   :  { %v587_v31 = vpop.f32.mrb[6].mxu0 }
 0x657   :  { %v4835_v32 = vpop.f32.mrb[7].mxu0 }
 0x65a   :  { %v742_v33 = vpop.f32.mrb[8].mxu0 }
 0x65b   :  { %v746_v34 = vmul.f32 0.35355338, %v742_v33  ;;  %v4845_v35 = vpop.f32.mrb[9].mxu0 }
 0x65d   :  { %v747_v36 = vadd.f32 %v746_v34, %v5433_v55 }
 0x65f   :  { %v748_v37 = vsel %vm183_vm6, %v747_v36, -inf }
 0x660   :  { %749 = vmax.xlane.f32.xlu0 %v748_v37 }
 0x676   :  { %592 = vrot.lane.b32.xlu0 %v5368_v14, %s5296_s24 }
 0x67a   :  { %915 = vrot.lane.b32.xlu0 %v5411_v50, %s5301_s28 }
 0x6ed   :  { %v750_v38 = vpop.xlane.xlu0 %749 }
 0x6ee   :  { %v751_v39 = vsub.f32 %v747_v36, %v750_v38 }
 0x6f0   :  { %v752_v40 = vmul.f32 1.442695, %v751_v39 }
 0x6f1   :  { %v5479_v41 = vpop.permute.xlu0 %592 }
 0x6f2   :  { %5194 = vpow2.f32 %v752_v40  ;;  %4837 = vmatpush3.msra.mxu1 %v5479_v41 }
 0x6f3   :  { %4839 = vmatmul.mubr.msk.f32.vlgmr.msra.gmra.mrb[4].mxu1 %vm183_vm6, %v343_v25  ;;  %4846 = vmatprep.subr.mxu1 %v5290_v46 }
 0x6f4   :  { %4847 = vmatpush3.msra.mxu1 %v760_v42  ;;  %4848 = vmatprep.mubr.msk.f32.mxu1 %vm5291_vm5, %v5290_v46 }
 0x6f5   :  { %4856 = vmatprep.subr.mxu1 %v5290_v46  ;;  %v916_v51 = vpop.permute.xlu0 %915 }
 0x6fc   :  { %v5195_v14 = vpop.eup %5194 }
 0x6fd   :  { %v754_v43 = vsel %vm183_vm6, %v5195_v14, 0.0 }
 0x6fe   :  { %755 = vadd.xlane.f32.xlu1 %v754_v43 }
 0x70f   :  { %913 = vrot.lane.b32.xlu1 %v5411_v50, %s5302_s29 }
 0x713   :  { %1004 = vrot.lane.b32.xlu1 %v5411_v50, %s5303_s30 }
 0x78b   :  { %v756_v44 = vpop.xlane.xlu1 %755 }
 0x78c   :  { %5196 = vrcp.f32 %v756_v44 }
 0x78f   :  { %v914_v52 = vpop.permute.xlu1 %913 }
 0x793   :  { %v1005_v5 = vpop.permute.xlu1 %1004 }
 0x796   :  { %v5197_v45 = vpop.eup %5196 }
 0x797   :  { %v758_v49 = vmul.f32 %v5197_v45, %v5195_v14 }
 0x799   :  { %4849 = vmatmul.mubr.msk.f32.vlgmr.msra.gmra.mrb[6].mxu1 %vm183_vm6, %v758_v49 }
 0x79a   :  { %4857 = vmatpush3.xpose.msk.msra.mxu1 %vm183_vm6, %v916_v51  ;;  %4858 = vmatprep.mubr.msk.f32.mxu1 %vm5291_vm5, %v5290_v46 }
 0x79b   :  { %4866 = vmatprep.subr.mxu1 %v5290_v46 }
 0x79d   :  { %4859 = vmatmul.mubr.msk.f32.vlgmr.msra.gmra.mrb[8].mxu1 %vm183_vm6, %v914_v52 }
 0x79e   :  { %4868 = vmatprep.mubr.msk.f32.mxu1 %vm5291_vm5, %v5290_v46 }
 0x7c6   :  { %v664_v50 = vpop.f32.mrb[4].mxu1 }
 0x7c7   :  { %v665_v53 = vadd.f32 %v664_v50, %v587_v31  ;;  %v4840_v54 = vpop.f32.mrb[5].mxu1 }
 0x86c   :  { %v831_v56 = vpop.f32.mrb[6].mxu1 }
 0x86d   :  { %v4850_v57 = vpop.f32.mrb[7].mxu1 }
 0x870   :  { %v987_v58 = vpop.f32.mrb[8].mxu1 }
 0x871   :  { %v991_v59 = vmul.f32 0.35355338, %v987_v58  ;;  %v4860_v60 = vpop.f32.mrb[9].mxu1 }
 0x873   :  { %v992_v61 = vadd.f32 %v991_v59, %v5433_v55 }
 0x875   :  { %v993_v62 = vsel %vm183_vm6, %v992_v61, -inf }
 0x876   :  { %994 = vmax.xlane.f32.xlu0 %v993_v62 }
 0x88c   :  { %836 = vrot.lane.b32.xlu0 %v5378_v16, %s5296_s24 }
 0x890   :  { %1165 = vrot.lane.b32.xlu0 %v5506_v63, %s5293_s19 }
 0x894   :  { %1330 = vrot.lane.b32.xlu0 %v5506_v63, %s5294_s20 }
 0x903   :  { %v995_v2 = vpop.xlane.xlu0 %994 }
 0x904   :  { %v996_v3 = vsub.f32 %v992_v61, %v995_v2 }
 0x906   :  { %v997_v4 = vmul.f32 1.442695, %v996_v3 }
 0x907   :  { %v5512_v55 = vpop.permute.xlu0 %836 }
 0x908   :  { %5198 = vpow2.f32 %v997_v4  ;;  %4852 = vmatpush3.msra.mxu0 %v5512_v55 }
 0x909   :  { %4854 = vmatmul.mubr.msk.f32.vlgmr.msra.gmra.mrb[10].mxu0 %vm183_vm6, %v831_v56  ;;  %4861 = vmatprep.subr.mxu0 %v5290_v46 }
 0x90a   :  { %4862 = vmatpush3.msra.mxu0 %v1005_v5  ;;  %4863 = vmatprep.mubr.msk.f32.mxu0 %vm5291_vm5, %v5290_v46 }
 0x90b   :  { %4871 = vmatprep.subr.mxu0 %v5290_v46  ;;  %v1166_v9 = vpop.permute.xlu0 %1165 }
 0x90f   :  { %v1331_v12 = vpop.permute.xlu0 %1330 }
 0x912   :  { %v5199_v16 = vpop.eup %5198 }
 0x913   :  { %v999_v48 = vsel %vm183_vm6, %v5199_v16, 0.0 }
 0x914   :  { %1000 = vadd.xlane.f32.xlu1 %v999_v48 }
 0x925   :  { %1332 = vrot.lane.b32.xlu1 %v5506_v63, %s5292_s18 }
 0x9a1   :  { %v1001_v6 = vpop.xlane.xlu1 %1000 }
 0x9a2   :  { %5200 = vrcp.f32 %v1001_v6 }
 0x9a5   :  { %v1333_v11 = vpop.permute.xlu1 %1332 }
 0x9ac   :  { %v5201_v7 = vpop.eup %5200 }
 0x9ad   :  { %v1003_v8 = vmul.f32 %v5201_v7, %v5199_v16 }
 0x9af   :  { %4864 = vmatmul.mubr.msk.f32.vlgmr.msra.gmra.mrb[12].mxu0 %vm183_vm6, %v1003_v8 }
 0x9b0   :  { %4872 = vmatpush3.xpose.msk.msra.mxu0 %vm183_vm6, %v1166_v9  ;;  %4873 = vmatprep.mubr.msk.f32.mxu0 %vm5291_vm5, %v5290_v46 }
 0x9b1   :  { %4881 = vmatprep.subr.mxu0 %v5290_v46 }
 0x9b3   :  { %4874 = vmatmul.mubr.msk.f32.vlgmr.msra.gmra.mrb[14].mxu0 %vm183_vm6, %v5506_v63 }
 0x9b4   :  { %4882 = vmatpush3.xpose.msk.msra.mxu0 %vm183_vm6, %v1333_v11  ;;  %4883 = vmatprep.mubr.msk.f32.mxu0 %vm5291_vm5, %v5290_v46 }
 0x9b5   :  { %4891 = vmatprep.subr.mxu0 %v5290_v46 }
 0x9b7   :  { %4884 = vmatmul.mubr.msk.f32.vlgmr.msra.gmra.mrb[16].mxu0 %vm183_vm6, %v1331_v12 }
 0x9b8   :  { %4892 = vmatpush3.msra.mxu0 %v5450_v10  ;;  %4893 = vmatprep.mubr.msk.f32.mxu0 %vm5291_vm5, %v5290_v46 }
 0x9b9   :  { %4901 = vmatprep.subr.mxu0 %v5290_v46 }
 0x9dc   :  { %v908_v13 = vpop.f32.mrb[10].mxu0 }
 0x9dd   :  { %v912_v15 = vadd.f32 %v908_v13, %v665_v53  ;;  %v4855_v17 = vpop.f32.mrb[11].mxu0 }
 0xa82   :  { %v1076_v19 = vpop.f32.mrb[12].mxu0 }
 0xa83   :  { %v4865_v20 = vpop.f32.mrb[13].mxu0 }
 0xa86   :  { %v1237_v21 = vpop.f32.mrb[14].mxu0 }
 0xa87   :  { %v1241_v23 = vmul.f32 0.35355338, %v1237_v21  ;;  %v4875_v24 = vpop.f32.mrb[15].mxu0 }
 0xa89   :  { %v1242_v10 = vadd.f32 %v5542_v22, %v1241_v23 }
 0xa8a   :  { %v1404_v25 = vpop.f32.mrb[16].mxu0 }
 0xa8b   :  { %v1408_v26 = vmul.f32 0.35355338, %v1404_v25  ;;  %v4885_v27 = vpop.f32.mrb[17].mxu0  ;;  %v1243_v28 = vsel %vm183_vm6, %v1242_v10, -inf }
 0xa8c   :  { %1244 = vmax.xlane.f32.xlu1 %v1243_v28 }
 0xa8d   :  { %v1409_v29 = vadd.f32 %v5542_v22, %v1408_v26 }
 0xa8f   :  { %v1410_v30 = vsel %vm183_vm6, %v1409_v29, -inf }
 0xa90   :  { %1411 = vmax.xlane.f32.xlu0 %v1410_v30 }
 0xa9d   :  { %1081 = vrot.lane.b32.xlu1 %v5385_v18, %s5296_s24 }
 0xaa1   :  { %1421 = vrot.lane.b32.xlu1 %v5506_v63, %s5300_s0 }
 0xaa5   :  { %1645 = vrot.lane.b32.xlu1 %v5506_v63, %s5297_s25 }
 0xaa9   :  { %1643 = vrot.lane.b32.xlu1 %v5506_v63, %s5298_s26 }
 0xb19   :  { %v1245_v31 = vpop.xlane.xlu1 %1244 }
 0xb1a   :  { %v1246_v32 = vsub.f32 %v1242_v10, %v1245_v31 }
 0xb1c   :  { %v1247_v33 = vmul.f32 1.442695, %v1246_v32 }
 0xb1d   :  { %v5556_v34 = vpop.permute.xlu1 %1081  ;;  %v1412_v35 = vpop.xlane.xlu0 %1411 }
 0xb1e   :  { %5202 = vpow2.f32 %v1247_v33  ;;  %v1413_v36 = vsub.f32 %v1409_v29, %v1412_v35  ;;  %4867 = vmatpush3.msra.mxu1 %v5556_v34 }
 0xb1f   :  { %4869 = vmatmul.mubr.msk.f32.vlgmr.msra.gmra.mrb[10].mxu1 %vm183_vm6, %v1076_v19  ;;  %4876 = vmatprep.subr.mxu1 %v5290_v46 }
 0xb20   :  { %v1414_v18 = vmul.f32 1.442695, %v1413_v36  ;;  %4878 = vmatprep.mubr.msk.f32.mxu1 %vm5291_vm5, %v5290_v46 }
 0xb21   :  { %v1422_v49 = vpop.permute.xlu1 %1421 }
 0xb22   :  { %5204 = vpow2.f32 %v1414_v18 }
 0xb25   :  { %v1646_v58 = vpop.permute.xlu1 %1645 }
 0xb28   :  { %v5203_v37 = vpop.eup %5202 }
 0xb29   :  { %v1249_v38 = vsel %vm183_vm6, %v5203_v37, 0.0 }
 0xb2a   :  { %1250 = vadd.xlane.f32.xlu0 %v1249_v38 }
 0xb2c   :  { %v5205_v39 = vpop.eup %5204 }
 0xb2d   :  { %v1416_v40 = vsel %vm183_vm6, %v5205_v39, 0.0 }
 0xb2e   :  { %1417 = vadd.xlane.f32.xlu0 %v1416_v40 }
 0xb44   :  { %1254 = vrot.lane.b32.xlu0 %v5506_v63, %s5295_s23 }
 0xbb7   :  { %v1251_v42 = vpop.xlane.xlu0 %1250 }
 0xbb8   :  { %5206 = vrcp.f32 %v1251_v42 }
 0xbbb   :  { %v1418_v14 = vpop.xlane.xlu0 %1417 }
 0xbbc   :  { %5208 = vrcp.f32 %v1418_v14 }
 0xbbf   :  { %v1255_v43 = vpop.permute.xlu0 %1254 }
 0xbc0   :  { %4877 = vmatpush3.msra.mxu1 %v1255_v43 }
 0xbc1   :  { %4886 = vmatprep.subr.mxu1 %v5290_v46 }
 0xbc2   :  { %v5207_v44 = vpop.eup %5206 }
 0xbc3   :  { %v1253_v45 = vmul.f32 %v5207_v44, %v5203_v37 }
 0xbc5   :  { %4879 = vmatmul.mubr.msk.f32.vlgmr.msra.gmra.mrb[12].mxu1 %vm183_vm6, %v1253_v45 }
 0xbc6   :  { %v5209_v51 = vpop.eup %5208  ;;  %4887 = vmatpush3.msra.mxu1 %v1422_v49  ;;  %4888 = vmatprep.mubr.msk.f32.mxu1 %vm5291_vm5, %v5290_v46 }
 0xbc7   :  { %v1420_v52 = vmul.f32 %v5209_v51, %v5205_v39  ;;  %4896 = vmatprep.subr.mxu1 %v5290_v46 }
 0xbc9   :  { %4889 = vmatmul.mubr.msk.f32.vlgmr.msra.gmra.mrb[14].mxu1 %vm183_vm6, %v1420_v52 }
 0xbca   :  { %4897 = vmatpush3.msra.mxu1 %v5479_v41  ;;  %4898 = vmatprep.mubr.msk.f32.mxu1 %vm5291_vm5, %v5290_v46  ;;  %v1644_v41 = vpop.permute.xlu1 %1643 }
 0xbcb   :  { %4906 = vmatprep.subr.mxu1 %v5290_v46 }
 0xbf2   :  { %v1153_v50 = vpop.f32.mrb[10].mxu1 }
 0xbf3   :  { %v5577_v53 = vadd.f32 %v1153_v50, %v912_v15  ;;  %v4870_v54 = vpop.f32.mrb[11].mxu1 }
 0xc98   :  { %v1326_v56 = vpop.f32.mrb[12].mxu1 }
 0xc99   :  { %v4880_v57 = vpop.f32.mrb[13].mxu1  ;;  %4899 = vmatmul.mubr.msk.f32.vlgmr.msra.gmra.mrb[16].mxu1 %vm183_vm6, %v1326_v56 }
 0xc9a   :  { %4908 = vmatprep.mubr.msk.f32.mxu1 %vm5291_vm5, %v5290_v46  ;;  %v5639_v57 = vld [vmem:[%s6014_s4 + $0x20] sm:$0xff] }
 0xc9c   :  { %v1493_v59 = vpop.f32.mrb[14].mxu1 }
 0xc9d   :  { %v4890_v60 = vpop.f32.mrb[15].mxu1  ;;  %4894 = vmatmul.mubr.msk.f32.vlgmr.msra.gmra.mrb[18].mxu0 %vm183_vm6, %v1493_v59 }
 0xc9e   :  { %4902 = vmatpush3.xpose.msk.msra.mxu0 %vm183_vm6, %v1646_v58  ;;  %4903 = vmatprep.mubr.msk.f32.mxu0 %vm5291_vm5, %v5290_v46  ;;  %v5644_v58 = vld [vmem:[%s6014_s4 + $0x28] sm:$0xff] }
 0xc9f   :  { %4911 = vmatprep.subr.mxu0 %v5290_v46 }
 0xca1   :  { %4904 = vmatmul.mubr.msk.f32.vlgmr.msra.gmra.mrb[20].mxu0 %vm183_vm6, %v1644_v41 }
 0xca2   :  { %4912 = vmatpush3.msra.mxu0 %v5512_v55  ;;  %4913 = vmatprep.mubr.msk.f32.mxu0 %vm5291_vm5, %v5290_v46 }
 0xca3   :  { %4921 = vmatprep.subr.mxu0 %v5290_v46 }
 0xd6c   :  { %v1639_v61 = vpop.f32.mrb[16].mxu1 }
 0xd6d   :  { %v4900_v62 = vpop.f32.mrb[17].mxu1 }
 0xd70   :  { %v1566_v2 = vpop.f32.mrb[18].mxu0 }
 0xd71   :  { %v1640_v3 = vadd.f32 %v1639_v61, %v1566_v2  ;;  %v4895_v4 = vpop.f32.mrb[19].mxu0 }
 0xd74   :  { %v1717_v5 = vpop.f32.mrb[20].mxu0 }
 0xd75   :  { %v1721_v16 = vmul.f32 0.35355338, %v1717_v5  ;;  %v4905_v48 = vpop.f32.mrb[21].mxu0 }
 0xd77   :  { %v1722_v6 = vadd.f32 %v5542_v22, %v1721_v16 }
 0xd79   :  { %v1723_v7 = vsel %vm183_vm6, %v1722_v6, -inf }
 0xd7a   :  { %1724 = vmax.xlane.f32.xlu0 %v1723_v7 }
 0xd90   :  { %1734 = vrot.lane.b32.xlu0 %v5506_v63, %s5299_s27 }
 0xd94   :  { %1884 = vrot.lane.b32.xlu0 %v5506_v63, %s5302_s29 }
 0xe07   :  { %v1725_v55 = vpop.xlane.xlu0 %1724 }
 0xe08   :  { %v1726_v8 = vsub.f32 %v1722_v6, %v1725_v55  ;;  %v5658_v55 = vld [vmem:[%s6014_s4 + $0x30] sm:$0xff] }
 0xe0a   :  { %v1727_v9 = vmul.f32 1.442695, %v1726_v8  ;;  %v5663_v8 = vld [vmem:[%s6014_s4 + $0x38] sm:$0xff] }
 0xe0b   :  { %v1735_v11 = vpop.permute.xlu0 %1734 }
 0xe0c   :  { %5210 = vpow2.f32 %v1727_v9  ;;  %4907 = vmatpush3.msra.mxu1 %v1735_v11  ;;  %v5173_v9 = vpack.i.bf16 %v5663_v8, %v5658_v55  ;;  %v4617_v11 = vld [vmem:[%s6016_s6 + $0x63] ss:$0 sm:$0xff] }
 0xe0d   :  { %4916 = vmatprep.subr.mxu1 %v5290_v46 }
 0xe0f   :  { %v1885_v21 = vpop.permute.xlu0 %1884 }
 0xe16   :  { %v5211_v12 = vpop.eup %5210 }
 0xe17   :  { %v1729_v13 = vsel %vm183_vm6, %v5211_v12, 0.0 }
 0xe18   :  { %1730 = vadd.xlane.f32.xlu1 %v1729_v13 }
 0xe29   :  { %1886 = vrot.lane.b32.xlu1 %v5506_v63, %s5301_s28 }
 0xea5   :  { %v1731_v15 = vpop.xlane.xlu1 %1730 }
 0xea6   :  { %5212 = vrcp.f32 %v1731_v15  ;;  %v4618_v15 = vld [vmem:[%s6016_s6 + $0x66] ss:$0 sm:$0xff] }
 0xea9   :  { %v1887_v20 = vpop.permute.xlu1 %1886 }
 0xeb0   :  { %v5213_v17 = vpop.eup %5212 }
 0xeb1   :  { %v1733_v19 = vmul.f32 %v5213_v17, %v5211_v12 }
 0xeb3   :  { %4909 = vmatmul.mubr.msk.f32.vlgmr.msra.gmra.mrb[18].mxu1 %vm183_vm6, %v1733_v19 }
 0xeb4   :  { %4917 = vmatpush3.xpose.msk.msra.mxu1 %vm183_vm6, %v1887_v20  ;;  %4918 = vmatprep.mubr.msk.f32.mxu1 %vm5291_vm5, %v5290_v46 }
 0xeb5   :  { %4926 = vmatprep.subr.mxu1 %v5290_v46 }
 0xeb7   :  { %4919 = vmatmul.mubr.msk.f32.vlgmr.msra.gmra.mrb[20].mxu1 %vm183_vm6, %v1885_v21 }
 0xeb8   :  { %4927 = vmatpush3.msra.mxu1 %v5556_v34  ;;  %4928 = vmatprep.mubr.msk.f32.mxu1 %vm5291_vm5, %v5290_v46 }
 0xf86   :  { %v1806_v23 = vpop.f32.mrb[18].mxu1 }
 0xf87   :  { %v4910_v24 = vpop.f32.mrb[19].mxu1  ;;  %4914 = vmatmul.mubr.msk.f32.vlgmr.msra.gmra.mrb[22].mxu0 %vm183_vm6, %v1806_v23 }
 0xf88   :  { %4923 = vmatprep.mubr.msk.f32.mxu0 %vm5291_vm5, %v5290_v46 }
 0xf8a   :  { %v1958_v10 = vpop.f32.mrb[20].mxu1 }
 0xf8b   :  { %v1962_v25 = vmul.f32 0.35355338, %v1958_v10  ;;  %v4920_v26 = vpop.f32.mrb[21].mxu1  ;;  %v5111_v10 = vpack.c.bf16 %v5644_v58, %v5639_v57 }
 0xf8c   :  { %v5115_v26 = vpack.c.bf16 %v5663_v8, %v5658_v55 }
 0xf8d   :  { %v1963_v27 = vadd.f32 %v5542_v22, %v1962_v25  ;;  %v29_v25 = vld [vmem:[%s6011_s1] sm:$0xff] }
 0xf8f   :  { %v1964_v28 = vsel %vm183_vm6, %v1963_v27, -inf }
 0xf90   :  { %1965 = vmax.xlane.f32.xlu1 %v1964_v28 }
 0xfa1   :  { %1158 = vrot.lane.b32.xlu1 %v5406_v47, %s5296_s24 }
0x101d   :  { %v1966_v29 = vpop.xlane.xlu1 %1965 }
0x101e   :  { %v1967_v30 = vsub.f32 %v1963_v27, %v1966_v29  ;;  %v5687_v27 = vld [vmem:[%s6015_s5 + $0x1] ss:$0 sm:$0xff] }
0x1020   :  { %v1968_v31 = vmul.f32 1.442695, %v1967_v30 }
0x1021   :  { %v1159_v32 = vpop.permute.xlu1 %1158 }
0x1022   :  { %5214 = vpow2.f32 %v1968_v31  ;;  %v1161_v33 = vadd.f32 %v1159_v32, %v5577_v53 }
0x1024   :  { %v5620_v34 = vadd.f32 %v1161_v33, %v5350_v0 }
0x1026   :  { %v2130_v35 = vsel %vm33_vm0, %v5620_v34, 0.0 }
0x1027   :  { %2131 = vadd.xlane.f32.xlu1 %v2130_v35  ;;  %v30_v35 = vld [vmem:[%s6011_s1 + $0x8] sm:$0xff] }
0x102c   :  { %v5215_v22 = vpop.eup %5214 }
0x102d   :  { %v1970_v36 = vsel %vm183_vm6, %v5215_v22, 0.0 }
0x102e   :  { %1971 = vadd.xlane.f32.xlu0 %v1970_v36 }
0x1044   :  { %1975 = vrot.lane.b32.xlu0 %v5506_v63, %s5303_s30 }
0x105a   :  { %v1879_v47 = vpop.f32.mrb[22].mxu0 }
0x105b   :  { %v1883_v18 = vadd.f32 %v1879_v47, %v1640_v3  ;;  %v4915_v37 = vpop.f32.mrb[23].mxu0 }
0x10b4   :  { %v2132_v43 = vpop.xlane.xlu1 %2131 }
0x10b5   :  { %v2136_v44 = vmul.f32 0.03125, %v2132_v43 }
0x10b7   :  { %v2138_v51 = vsub.f32 %v5620_v34, %v2136_v44 }
0x10b9   :  { %v2140_v54 = vmul.f32 %v2138_v51, %v2138_v51  ;;  %v2154_v12 = vmul.f32 %v4617_v11, %v2138_v51 }
0x10bb   :  { %v1972_v38 = vpop.xlane.xlu0 %1971  ;;  %v2142_v56 = vsel %vm33_vm0, %v2140_v54, 0.0 }
0x10bc   :  { %5216 = vrcp.f32 %v1972_v38 }
0x10bf   :  { %v1976_v39 = vpop.permute.xlu0 %1975 }
0x10c0   :  { %4922 = vmatpush3.msra.mxu0 %v1976_v39 }
0x10c1   :  { %5112 = vmatprep.subr.bf16.mxu0 %v5111_v10 }
0x10c6   :  { %v5217_v0 = vpop.eup %5216 }
0x10c7   :  { %v1974_v40 = vmul.f32 %v5217_v0, %v5215_v22 }
0x10c9   :  { %4924 = vmatmul.mubr.msk.f32.vlgmr.msra.gmra.mrb[24].mxu0 %vm183_vm6, %v1974_v40 }
0x10ca   :  { %5114 = vmatpush3.bf16.msra.mxu0 %v5111_v10 }
0x10cb   :  { %5116 = vmatprep.subr.bf16.mxu0 %v5115_v26 }
0x10ce   :  { %5118 = vmatpush3.bf16.msra.mxu0 %v5115_v26 }
0x10cf   :  { %4953 = vmatprep.subr.mxu0 %v5290_v46 }
0x119c   :  { %v2047_v42 = vpop.f32.mrb[24].mxu0 }
0x119d   :  { %v4925_v14 = vpop.f32.mrb[25].mxu0  ;;  %4929 = vmatmul.mubr.msk.f32.vlgmr.msra.gmra.mrb[22].mxu1 %vm183_vm6, %v2047_v42 }
0x119e   :  { %4950 = vmatprep.mubr.msk.f32.mxu1 %vm33_vm0, %v29_v25 }
0x1270   :  { %v2120_v45 = vpop.f32.mrb[22].mxu1 }
0x1271   :  { %v2124_v49 = vadd.f32 %v2120_v45, %v1883_v18  ;;  %v4930_v63 = vpop.f32.mrb[23].mxu1 }
0x1273   :  { %v2125_v52 = vadd.f32 %v2124_v49, %v1159_v32 }
0x1275   :  { %v5631_v50 = vadd.f32 %v2125_v52, %v5355_v1  ;;  %v5168_v1 = vpack.i.bf16 %v5644_v58, %v5639_v57 }
0x1277   :  { %v2133_v53 = vsel %vm33_vm0, %v5631_v50, 0.0  ;;  %5169 = vrot.lane.b32.xlu1 %v5168_v1, %s5293_s19 }
0x1278   :  { %2134 = vadd.xlane.f32.xlu0 %v2133_v53 }
0x127b   :  { %2292 = vrot.lane.b32.xlu1 %v5687_v27, %s5293_s19 }
0x127c   :  { %2143 = vadd.xlane.f32.xlu0 %v2142_v56  ;;  %v5733_v56 = vld [vmem:[%s6013_s3] sm:$0xff] }
0x12e9   :  { %v5170_v20 = vpop.permute.xlu1 %5169 }
0x12ea   :  { %v5172_v21 = vunpack.i.h.bf16 %v5170_v20  ;;  %v5171_v23 = vunpack.i.l.bf16 %v5170_v20 }
0x12ec   :  { %v5119_v24 = vpack.c.bf16 %v5172_v21, %v5171_v23 }
0x12ed   :  { %v5702_v14 = vpop.permute.xlu1 %2292 }
0x12ee   :  { %5120 = vmatprep.subr.bf16.mxu1 %v5119_v24 }
0x12ef   :  { %5122 = vmatpush3.bf16.msra.mxu1 %v5119_v24 }
0x1305   :  { %v2135_v59 = vpop.xlane.xlu0 %2134 }
0x1306   :  { %v2137_v60 = vmul.f32 0.03125, %v2135_v59 }
0x1308   :  { %v5650_v41 = vsub.f32 %v5631_v50, %v2137_v60 }
0x1309   :  { %v2144_v61 = vpop.xlane.xlu0 %2143 }
0x130a   :  { %v2148_v62 = vmul.f32 0.032258064, %v2144_v61  ;;  %v2141_v2 = vmul.f32 %v5650_v41, %v5650_v41  ;;  %v2155_v39 = vmul.f32 %v4617_v11, %v5650_v41 }
0x130c   :  { %5218 = vrsqrt.f32 %v2148_v62  ;;  %v2145_v3 = vsel %vm33_vm0, %v2141_v2, 0.0  ;;  %vm2158_vm7 = vcmp.eq.f32.partialorder %v2148_v62, inf  ;;  %v2161_v16 = vand.u32 2147483648, %v2148_v62 }
0x130d   :  { %2146 = vadd.xlane.f32.xlu0 %v2145_v3  ;;  %vm2160_vm8 = vcmp.eq.f32.partialorder %v2148_v62, 0.0 }
0x1316   :  { %v5219_v4 = vpop.eup %5218 }
0x1317   :  { %v2157_v5 = vmul.f32 %v5219_v4, %v2148_v62 }
0x1319   :  { %v2159_v48 = vsel %vm2158_vm7, %v2148_v62, %v2157_v5 }
0x131a   :  { %v2162_v6 = vsel %vm2160_vm8, %v2161_v16, %v2159_v48 }
0x131b   :  { %v2170_v7 = vadd.f32 1e-06, %v2162_v6 }
0x131d   :  { %5220 = vrcp.f32 %v2170_v7 }
0x1323   :  { %5174 = vrot.lane.b32.xlu0 %v5173_v9, %s5293_s19 }
0x1327   :  { %v5221_v13 = vpop.eup %5220 }
0x1328   :  { %v2173_v17 = vmul.f32 %v5221_v13, %v2154_v12 }
0x132a   :  { %v2180_v19 = vadd.f32 %v4618_v15, %v2173_v17 }
0x132c   :  { %4939 = vmatprep.mubr.msk.f32.mxu0 %vm33_vm0, %v2180_v19 }
0x139a   :  { %v2147_v28 = vpop.xlane.xlu0 %2146 }
0x139b   :  { %v2149_v29 = vmul.f32 0.032258064, %v2147_v28 }
0x139d   :  { %5222 = vrsqrt.f32 %v2149_v29  ;;  %vm2165_vm9 = vcmp.eq.f32.partialorder %v2149_v29, inf  ;;  %v2168_v47 = vand.u32 2147483648, %v2149_v29  ;;  %vm2167_vm10 = vcmp.eq.f32.partialorder %v2149_v29, 0.0 }
0x139e   :  { %v5175_v30 = vpop.permute.xlu0 %5174 }
0x139f   :  { %v5177_v31 = vunpack.i.h.bf16 %v5175_v30  ;;  %v5176_v32 = vunpack.i.l.bf16 %v5175_v30 }
0x13a1   :  { %v5123_v33 = vpack.c.bf16 %v5177_v31, %v5176_v32 }
0x13a3   :  { %5124 = vmatprep.subr.bf16.mxu1 %v5123_v33 }
0x13a4   :  { %5126 = vmatpush3.bf16.msra.mxu1 %v5123_v33 }
0x13a5   :  { %4958 = vmatprep.subr.mxu1 %v5290_v46 }
0x13a7   :  { %v5223_v22 = vpop.eup %5222  ;;  %4951 = vmatmul.mubr.msk.f32.vlgmr.msra.gmra.mrb[24].mxu1 %vm33_vm0, %v30_v35 }
0x13a8   :  { %v2164_v36 = vmul.f32 %v5223_v22, %v2149_v29  ;;  %4960 = vmatprep.mubr.msk.f32.mxu1 %vm5291_vm5, %v5290_v46 }
0x13aa   :  { %v2166_v18 = vsel %vm2165_vm9, %v2149_v29, %v2164_v36 }
0x13ab   :  { %v2169_v37 = vsel %vm2167_vm10, %v2168_v47, %v2166_v18 }
0x13ac   :  { %v2171_v38 = vadd.f32 1e-06, %v2169_v37 }
0x13ae   :  { %5224 = vrcp.f32 %v2171_v38 }
0x13b8   :  { %v5225_v0 = vpop.eup %5224 }
0x13b9   :  { %v2175_v40 = vmul.f32 %v5225_v0, %v2155_v39 }
0x13bb   :  { %v2181_v42 = vadd.f32 %v4618_v15, %v2175_v40 }
0x13bd   :  { %4940 = vmatmul.mubr.msk.f32.vlgmr.msra.gmra.mrb[26].mxu0 %vm33_vm0, %v2181_v42 }
0x13be   :  { %4955 = vmatprep.mubr.msk.f32.mxu0 %vm5291_vm5, %v5290_v46 }
0x147a   :  { %v5704_v43 = vpop.f32.mrb[24].mxu1 }
0x147b   :  { %v2367_v44 = vpop.f32.mrb[25].mxu1 }
0x147c   :  { %v5707_v45 = vadd.f32 %v2367_v44, %v5702_v14 }
0x147e   :  { %2544 = vrot.lane.b32.xlu1 %v5707_v45, %s5294_s20  ;;  %4954 = vmatpush3.xpose.msk.msra.mxu0 %vm183_vm6, %v5707_v45 }
0x147f   :  { %4963 = vmatprep.subr.mxu0 %v5290_v46 }
0x1490   :  { %v5714_v49 = vpop.f32.mrb[26].mxu0 }
0x1491   :  { %v2267_v63 = vpop.f32.mrb[27].mxu0 }
0x1492   :  { %v5717_v51 = vadd.f32 %v5687_v27, %v2267_v63 }
0x1494   :  { %2542 = vrot.lane.b32.xlu1 %v5717_v51, %s5294_s20  ;;  %4956 = vmatmul.mubr.msk.f32.vlgmr.msra.gmra.mrb[28].mxu0 %vm183_vm6, %v5717_v51 }
0x1495   :  { %4965 = vmatprep.mubr.msk.f32.mxu0 %vm5291_vm5, %v5290_v46 }
0x14f0   :  { %v2545_v52 = vpop.permute.xlu1 %2544 }
0x14f1   :  { %4964 = vmatpush3.xpose.msk.msra.mxu0 %vm183_vm6, %v2545_v52 }
0x14f2   :  { %4973 = vmatprep.subr.mxu0 %v5290_v46 }
0x1506   :  { %v2543_v53 = vpop.permute.xlu1 %2542 }
0x1507   :  { %4966 = vmatmul.mubr.msk.f32.vlgmr.msra.gmra.mrb[30].mxu0 %vm183_vm6, %v2543_v53 }
0x1508   :  { %4975 = vmatprep.mubr.msk.f32.mxu0 %vm5291_vm5, %v5290_v46 }
0x1567   :  { %v2449_v54 = vpop.f32.mrb[28].mxu0 }
0x1568   :  { %v2453_v1 = vmul.f32 0.35355338, %v2449_v54  ;;  %v4957_v59 = vpop.f32.mrb[29].mxu0 }
0x156a   :  { %v2454_v60 = vadd.f32 %v2453_v1, %v5733_v56 }
0x156c   :  { %v2455_v41 = vsel %vm183_vm6, %v2454_v60, -inf }
0x156d   :  { %2456 = vmax.xlane.f32.xlu0 %v2455_v41 }
0x15da   :  { %v2616_v61 = vpop.f32.mrb[30].mxu0 }
0x15db   :  { %v2620_v62 = vmul.f32 0.35355338, %v2616_v61  ;;  %v4967_v2 = vpop.f32.mrb[31].mxu0 }
0x15dd   :  { %v2621_v3 = vadd.f32 %v2620_v62, %v5733_v56 }
0x15df   :  { %v2622_v4 = vsel %vm183_vm6, %v2621_v3, -inf }
0x15e0   :  { %2623 = vmax.xlane.f32.xlu1 %v2622_v4 }
0x15f1   :  { %2633 = vrot.lane.b32.xlu1 %v5707_v45, %s5292_s18 }
0x15f5   :  { %2709 = vrot.lane.b32.xlu1 %v5644_v58, %s5296_s24 }
0x15f9   :  { %2863 = vrot.lane.b32.xlu1 %v5707_v45, %s5298_s26 }
0x15fa   :  { %v2457_v5 = vpop.xlane.xlu0 %2456 }
0x15fb   :  { %v2458_v16 = vsub.f32 %v2454_v60, %v2457_v5 }
0x15fd   :  { %v2459_v48 = vmul.f32 1.442695, %v2458_v16  ;;  %v5806_v16 = vadd.f32 %v5704_v43, %v5702_v14 }
0x15ff   :  { %5226 = vpow2.f32 %v2459_v48 }
0x1609   :  { %v5227_v6 = vpop.eup %5226 }
0x160a   :  { %v2461_v7 = vsel %vm183_vm6, %v5227_v6, 0.0 }
0x160b   :  { %2462 = vadd.xlane.f32.xlu0 %v2461_v7 }
0x166d   :  { %v2624_v9 = vpop.xlane.xlu1 %2623 }
0x166e   :  { %v2625_v11 = vsub.f32 %v2621_v3, %v2624_v9 }
0x1670   :  { %v2626_v12 = vmul.f32 1.442695, %v2625_v11 }
0x1671   :  { %v2634_v13 = vpop.permute.xlu1 %2633 }
0x1672   :  { %5228 = vpow2.f32 %v2626_v12 }
0x1675   :  { %v5746_v15 = vpop.permute.xlu1 %2709 }
0x1676   :  { %4974 = vmatpush3.msra.mxu0 %v5746_v15 }
0x1677   :  { %4983 = vmatprep.subr.mxu0 %v5290_v46 }
0x1679   :  { %v2864_v31 = vpop.permute.xlu1 %2863 }
0x167c   :  { %v5229_v58 = vpop.eup %5228 }
0x167d   :  { %v2628_v17 = vsel %vm183_vm6, %v5229_v58, 0.0 }
0x167e   :  { %2629 = vadd.xlane.f32.xlu0 %v2628_v17 }
0x1694   :  { %2466 = vrot.lane.b32.xlu0 %v5707_v45, %s5293_s19 }
0x1698   :  { %2861 = vrot.lane.b32.xlu0 %v5717_v51, %s5298_s26  ;;  %v2463_v19 = vpop.xlane.xlu0 %2462 }
0x1699   :  { %5230 = vrcp.f32 %v2463_v19 }
0x169c   :  { %2785 = vrot.lane.b32.xlu0 %v5639_v57, %s5296_s24 }
0x16a3   :  { %v5231_v21 = vpop.eup %5230 }
0x16a4   :  { %v2465_v23 = vmul.f32 %v5231_v21, %v5227_v6 }
0x170b   :  { %v2630_v20 = vpop.xlane.xlu0 %2629 }
0x170c   :  { %5232 = vrcp.f32 %v2630_v20 }
0x170f   :  { %v2467_v24 = vpop.permute.xlu0 %2466 }
0x1710   :  { %4959 = vmatpush3.msra.mxu1 %v2467_v24  ;;  %v5848_v24 = vld [vmem:[%s6013_s3 + $0x8] sm:$0xff] }
0x1711   :  { %4961 = vmatmul.mubr.msk.f32.vlgmr.msra.gmra.mrb[26].mxu1 %vm183_vm6, %v2465_v23  ;;  %4968 = vmatprep.subr.mxu1 %v5290_v46 }
0x1712   :  { %4969 = vmatpush3.msra.mxu1 %v2634_v13  ;;  %4970 = vmatprep.mubr.msk.f32.mxu1 %vm5291_vm5, %v5290_v46 }
0x1713   :  { %v2862_v10 = vpop.permute.xlu0 %2861  ;;  %4978 = vmatprep.subr.mxu1 %v5290_v46 }
0x1716   :  { %v5233_v57 = vpop.eup %5232 }
0x1717   :  { %v2632_v25 = vmul.f32 %v5233_v57, %v5229_v58  ;;  %v5762_v26 = vpop.permute.xlu0 %2785 }
0x1719   :  { %4971 = vmatmul.mubr.msk.f32.vlgmr.msra.gmra.mrb[28].mxu1 %vm183_vm6, %v2632_v25 }
0x171a   :  { %4979 = vmatpush3.msra.mxu1 %v5762_v26  ;;  %4980 = vmatprep.mubr.msk.f32.mxu1 %vm5291_vm5, %v5290_v46 }
0x171b   :  { %4988 = vmatprep.subr.mxu1 %v5290_v46 }
0x17e4   :  { %v2538_v28 = vpop.f32.mrb[26].mxu1 }
0x17e5   :  { %v4962_v29 = vpop.f32.mrb[27].mxu1  ;;  %4981 = vmatmul.mubr.msk.f32.vlgmr.msra.gmra.mrb[30].mxu1 %vm183_vm6, %v2538_v28 }
0x17e6   :  { %4990 = vmatprep.mubr.msk.f32.mxu1 %vm5291_vm5, %v5290_v46 }
0x17ec   :  { %v2705_v30 = vpop.f32.mrb[28].mxu1 }
0x17ed   :  { %v4972_v32 = vpop.f32.mrb[29].mxu1  ;;  %4976 = vmatmul.mubr.msk.f32.vlgmr.msra.gmra.mrb[32].mxu0 %vm183_vm6, %v2705_v30 }
0x17ee   :  { %4984 = vmatpush3.xpose.msk.msra.mxu0 %vm183_vm6, %v2864_v31  ;;  %4985 = vmatprep.mubr.msk.f32.mxu0 %vm5291_vm5, %v5290_v46 }
0x17ef   :  { %4993 = vmatprep.subr.mxu0 %v5290_v46 }
0x17f1   :  { %4986 = vmatmul.mubr.msk.f32.vlgmr.msra.gmra.mrb[34].mxu0 %vm183_vm6, %v2862_v10 }
0x17f2   :  { %4995 = vmatprep.mubr.msk.f32.mxu0 %vm5291_vm5, %v5290_v46 }
0x18b8   :  { %v2857_v33 = vpop.f32.mrb[30].mxu1 }
0x18b9   :  { %v4982_v35 = vpop.f32.mrb[31].mxu1 }
0x18c0   :  { %v2781_v22 = vpop.f32.mrb[32].mxu0 }
0x18c1   :  { %v5780_v36 = vadd.f32 %v2857_v33, %v2781_v22  ;;  %v4977_v47 = vpop.f32.mrb[33].mxu0 }
0x18c4   :  { %v2935_v18 = vpop.f32.mrb[34].mxu0 }
0x18c5   :  { %v2939_v37 = vmul.f32 0.35355338, %v2935_v18  ;;  %v4987_v38 = vpop.f32.mrb[35].mxu0 }
0x18c7   :  { %v2940_v39 = vadd.f32 %v2939_v37, %v5733_v56 }
0x18c9   :  { %v2941_v0 = vsel %vm183_vm6, %v2940_v39, -inf }
0x18ca   :  { %2942 = vmax.xlane.f32.xlu1 %v2941_v0 }
0x18db   :  { %2952 = vrot.lane.b32.xlu1 %v5707_v45, %s5297_s25 }
0x18df   :  { %3107 = vrot.lane.b32.xlu1 %v5707_v45, %s5302_s29 }
0x1957   :  { %v2943_v40 = vpop.xlane.xlu1 %2942 }
0x1958   :  { %v2944_v42 = vsub.f32 %v2940_v39, %v2943_v40 }
0x195a   :  { %v2945_v44 = vmul.f32 1.442695, %v2944_v42 }
0x195b   :  { %v2953_v63 = vpop.permute.xlu1 %2952 }
0x195c   :  { %5234 = vpow2.f32 %v2945_v44  ;;  %4989 = vmatpush3.msra.mxu1 %v2953_v63 }
0x195d   :  { %4998 = vmatprep.subr.mxu1 %v5290_v46 }
0x195f   :  { %v3108_v60 = vpop.permute.xlu1 %3107 }
0x1966   :  { %v5235_v52 = vpop.eup %5234 }
0x1967   :  { %v2947_v53 = vsel %vm183_vm6, %v5235_v52, 0.0 }
0x1968   :  { %2948 = vadd.xlane.f32.xlu0 %v2947_v53 }
0x197e   :  { %3105 = vrot.lane.b32.xlu0 %v5717_v51, %s5302_s29 }
0x19f5   :  { %v2949_v54 = vpop.xlane.xlu0 %2948 }
0x19f6   :  { %5236 = vrcp.f32 %v2949_v54 }
0x19f9   :  { %v3106_v41 = vpop.permute.xlu0 %3105 }
0x1a00   :  { %v5237_v1 = vpop.eup %5236 }
0x1a01   :  { %v2951_v59 = vmul.f32 %v5237_v1, %v5235_v52 }
0x1a03   :  { %4991 = vmatmul.mubr.msk.f32.vlgmr.msra.gmra.mrb[32].mxu1 %vm183_vm6, %v2951_v59 }
0x1a04   :  { %4999 = vmatpush3.xpose.msk.msra.mxu1 %vm183_vm6, %v3108_v60  ;;  %5000 = vmatprep.mubr.msk.f32.mxu1 %vm5291_vm5, %v5290_v46 }
0x1a05   :  { %5008 = vmatprep.subr.mxu1 %v5290_v46 }
0x1a07   :  { %5001 = vmatmul.mubr.msk.f32.vlgmr.msra.gmra.mrb[34].mxu1 %vm183_vm6, %v3106_v41 }
0x1a08   :  { %5010 = vmatprep.mubr.msk.f32.mxu1 %vm5291_vm5, %v5290_v46 }
0x1ad6   :  { %v3024_v51 = vpop.f32.mrb[32].mxu1 }
0x1ad7   :  { %v4992_v61 = vpop.f32.mrb[33].mxu1 }
0x1ada   :  { %v3179_v62 = vpop.f32.mrb[34].mxu1 }
0x1adb   :  { %v3183_v2 = vmul.f32 0.35355338, %v3179_v62  ;;  %v5002_v3 = vpop.f32.mrb[35].mxu1 }
0x1add   :  { %v3184_v4 = vadd.f32 %v3183_v2, %v5733_v56 }
0x1adf   :  { %v3185_v5 = vsel %vm183_vm6, %v3184_v4, -inf }
0x1ae0   :  { %3186 = vmax.xlane.f32.xlu1 %v3185_v5 }
0x1af1   :  { %3196 = vrot.lane.b32.xlu1 %v5707_v45, %s5301_s28  ;;  %v5815_v45 = vadd.f32 %v5714_v49, %v5687_v27 }
0x1af5   :  { %3522 = vrot.lane.b32.xlu1 %v5806_v16, %s5294_s20 }
0x1b6d   :  { %v3187_v48 = vpop.xlane.xlu1 %3186 }
0x1b6e   :  { %v3188_v6 = vsub.f32 %v3184_v4, %v3187_v48 }
0x1b70   :  { %v3189_v7 = vmul.f32 1.442695, %v3188_v6 }
0x1b71   :  { %v3197_v11 = vpop.permute.xlu1 %3196 }
0x1b72   :  { %5238 = vpow2.f32 %v3189_v7 }
0x1b75   :  { %v3523_v12 = vpop.permute.xlu1 %3522 }
0x1b7c   :  { %v5239_v9 = vpop.eup %5238 }
0x1b7d   :  { %v3191_v56 = vsel %vm183_vm6, %v5239_v9, 0.0 }
0x1b7e   :  { %3192 = vadd.xlane.f32.xlu0 %v3191_v56 }
0x1b94   :  { %3028 = vrot.lane.b32.xlu0 %v5658_v55, %s5296_s24 }
0x1b98   :  { %3520 = vrot.lane.b32.xlu0 %v5815_v45, %s5294_s20 }
0x1c0b   :  { %v3193_v14 = vpop.xlane.xlu0 %3192 }
0x1c0c   :  { %5240 = vrcp.f32 %v3193_v14 }
0x1c0f   :  { %v5819_v43 = vpop.permute.xlu0 %3028 }
0x1c10   :  { %4994 = vmatpush3.msra.mxu0 %v5819_v43 }
0x1c11   :  { %4996 = vmatmul.mubr.msk.f32.vlgmr.msra.gmra.mrb[36].mxu0 %vm183_vm6, %v3024_v51  ;;  %5003 = vmatprep.subr.mxu0 %v5290_v46 }
0x1c12   :  { %5004 = vmatpush3.msra.mxu0 %v3197_v11  ;;  %5005 = vmatprep.mubr.msk.f32.mxu0 %vm5291_vm5, %v5290_v46 }
0x1c13   :  { %5013 = vmatprep.subr.mxu0 %v5290_v46  ;;  %v3521_v13 = vpop.permute.xlu0 %3520 }
0x1c16   :  { %v5241_v55 = vpop.eup %5240 }
0x1c17   :  { %v3195_v49 = vmul.f32 %v5241_v55, %v5239_v9 }
0x1c19   :  { %5006 = vmatmul.mubr.msk.f32.vlgmr.msra.gmra.mrb[38].mxu0 %vm183_vm6, %v3195_v49 }
0x1c1a   :  { %5014 = vmatpush3.xpose.msk.msra.mxu0 %vm183_vm6, %v5806_v16  ;;  %5015 = vmatprep.mubr.msk.f32.mxu0 %vm5291_vm5, %v5290_v46 }
0x1c1b   :  { %5023 = vmatprep.subr.mxu0 %v5290_v46 }
0x1c1d   :  { %5016 = vmatmul.mubr.msk.f32.vlgmr.msra.gmra.mrb[40].mxu0 %vm183_vm6, %v5815_v45 }
0x1c1e   :  { %5024 = vmatpush3.xpose.msk.msra.mxu0 %vm183_vm6, %v3523_v12  ;;  %5025 = vmatprep.mubr.msk.f32.mxu0 %vm5291_vm5, %v5290_v46 }
0x1c1f   :  { %5033 = vmatprep.subr.mxu0 %v5290_v46 }
0x1c21   :  { %5026 = vmatmul.mubr.msk.f32.vlgmr.msra.gmra.mrb[42].mxu0 %vm183_vm6, %v3521_v13 }
0x1c22   :  { %5034 = vmatpush3.msra.mxu0 %v5746_v15  ;;  %5035 = vmatprep.mubr.msk.f32.mxu0 %vm5291_vm5, %v5290_v46 }
0x1c23   :  { %5043 = vmatprep.subr.mxu0 %v5290_v46 }
0x1ce4   :  { %v3100_v58 = vpop.f32.mrb[36].mxu0 }
0x1ce5   :  { %v3104_v17 = vadd.f32 %v3100_v58, %v5780_v36  ;;  %v4997_v19 = vpop.f32.mrb[37].mxu0 }
0x1cec   :  { %v3268_v20 = vpop.f32.mrb[38].mxu0 }
0x1ced   :  { %v5007_v21 = vpop.f32.mrb[39].mxu0 }
0x1cf0   :  { %v3427_v23 = vpop.f32.mrb[40].mxu0 }
0x1cf1   :  { %v3431_v10 = vmul.f32 0.35355338, %v3427_v23  ;;  %v5017_v57 = vpop.f32.mrb[41].mxu0 }
0x1cf3   :  { %v3432_v15 = vadd.f32 %v5848_v24, %v3431_v10 }
0x1cf4   :  { %v3594_v25 = vpop.f32.mrb[42].mxu0 }
0x1cf5   :  { %v3598_v28 = vmul.f32 0.35355338, %v3594_v25  ;;  %v5027_v29 = vpop.f32.mrb[43].mxu0  ;;  %v3433_v30 = vsel %vm183_vm6, %v3432_v15, -inf }
0x1cf6   :  { %3434 = vmax.xlane.f32.xlu1 %v3433_v30 }
0x1cf7   :  { %v3599_v31 = vadd.f32 %v5848_v24, %v3598_v28 }
0x1cf9   :  { %v3600_v32 = vsel %vm183_vm6, %v3599_v31, -inf }
0x1cfa   :  { %3601 = vmax.xlane.f32.xlu0 %v3600_v32 }
0x1d07   :  { %3272 = vrot.lane.b32.xlu1 %v5663_v8, %s5296_s24 }
0x1d0b   :  { %3611 = vrot.lane.b32.xlu1 %v5806_v16, %s5292_s18 }
0x1d0f   :  { %3835 = vrot.lane.b32.xlu1 %v5806_v16, %s5298_s26 }
0x1d13   :  { %3833 = vrot.lane.b32.xlu1 %v5815_v45, %s5298_s26 }
0x1d83   :  { %v3435_v33 = vpop.xlane.xlu1 %3434 }
0x1d84   :  { %v3436_v35 = vsub.f32 %v3432_v15, %v3435_v33 }
0x1d86   :  { %v3437_v22 = vmul.f32 1.442695, %v3436_v35 }
0x1d87   :  { %v5862_v36 = vpop.permute.xlu1 %3272  ;;  %v3602_v47 = vpop.xlane.xlu0 %3601 }
0x1d88   :  { %5242 = vpow2.f32 %v3437_v22  ;;  %v3603_v18 = vsub.f32 %v3599_v31, %v3602_v47  ;;  %5009 = vmatpush3.msra.mxu1 %v5862_v36 }
0x1d89   :  { %5011 = vmatmul.mubr.msk.f32.vlgmr.msra.gmra.mrb[36].mxu1 %vm183_vm6, %v3268_v20  ;;  %5018 = vmatprep.subr.mxu1 %v5290_v46 }
0x1d8a   :  { %v3604_v8 = vmul.f32 1.442695, %v3603_v18  ;;  %5020 = vmatprep.mubr.msk.f32.mxu1 %vm5291_vm5, %v5290_v46 }
0x1d8b   :  { %v3612_v53 = vpop.permute.xlu1 %3611 }
0x1d8c   :  { %5244 = vpow2.f32 %v3604_v8 }
0x1d8f   :  { %v3836_v62 = vpop.permute.xlu1 %3835 }
0x1d92   :  { %v5243_v37 = vpop.eup %5242 }
0x1d93   :  { %v3439_v38 = vsel %vm183_vm6, %v5243_v37, 0.0 }
0x1d94   :  { %3440 = vadd.xlane.f32.xlu0 %v3439_v38 }
0x1d96   :  { %v5245_v39 = vpop.eup %5244 }
0x1d97   :  { %v3606_v0 = vsel %vm183_vm6, %v5245_v39, 0.0 }
0x1d98   :  { %3607 = vadd.xlane.f32.xlu0 %v3606_v0 }
0x1dae   :  { %3444 = vrot.lane.b32.xlu0 %v5806_v16, %s5293_s19 }
0x1e21   :  { %v3441_v40 = vpop.xlane.xlu0 %3440 }
0x1e22   :  { %5246 = vrcp.f32 %v3441_v40 }
0x1e25   :  { %v3608_v42 = vpop.xlane.xlu0 %3607 }
0x1e26   :  { %5248 = vrcp.f32 %v3608_v42 }
0x1e29   :  { %v3445_v44 = vpop.permute.xlu0 %3444 }
0x1e2a   :  { %5019 = vmatpush3.msra.mxu1 %v3445_v44 }
0x1e2b   :  { %5028 = vmatprep.subr.mxu1 %v5290_v46 }
0x1e2c   :  { %v5247_v63 = vpop.eup %5246 }
0x1e2d   :  { %v3443_v52 = vmul.f32 %v5247_v63, %v5243_v37 }
0x1e2f   :  { %5021 = vmatmul.mubr.msk.f32.vlgmr.msra.gmra.mrb[38].mxu1 %vm183_vm6, %v3443_v52 }
0x1e30   :  { %v5249_v54 = vpop.eup %5248  ;;  %5029 = vmatpush3.msra.mxu1 %v3612_v53  ;;  %5030 = vmatprep.mubr.msk.f32.mxu1 %vm5291_vm5, %v5290_v46 }
0x1e31   :  { %v3610_v1 = vmul.f32 %v5249_v54, %v5245_v39  ;;  %5038 = vmatprep.subr.mxu1 %v5290_v46 }
0x1e33   :  { %5031 = vmatmul.mubr.msk.f32.vlgmr.msra.gmra.mrb[40].mxu1 %vm183_vm6, %v3610_v1 }
0x1e34   :  { %5039 = vmatpush3.msra.mxu1 %v5762_v26  ;;  %5040 = vmatprep.mubr.msk.f32.mxu1 %vm5291_vm5, %v5290_v46  ;;  %v3834_v26 = vpop.permute.xlu1 %3833 }
0x1e35   :  { %5048 = vmatprep.subr.mxu1 %v5290_v46 }
0x1e5c   :  { %v3344_v59 = vpop.f32.mrb[36].mxu1 }
0x1e5d   :  { %v5883_v60 = vadd.f32 %v3344_v59, %v3104_v17  ;;  %v5012_v41 = vpop.f32.mrb[37].mxu1 }
0x1f02   :  { %v3516_v51 = vpop.f32.mrb[38].mxu1 }
0x1f03   :  { %v5022_v61 = vpop.f32.mrb[39].mxu1  ;;  %5041 = vmatmul.mubr.msk.f32.vlgmr.msra.gmra.mrb[42].mxu1 %vm183_vm6, %v3516_v51 }
0x1f04   :  { %5050 = vmatprep.mubr.msk.f32.mxu1 %vm5291_vm5, %v5290_v46 }
0x1f06   :  { %v3683_v2 = vpop.f32.mrb[40].mxu1 }
0x1f07   :  { %v5032_v3 = vpop.f32.mrb[41].mxu1  ;;  %5036 = vmatmul.mubr.msk.f32.vlgmr.msra.gmra.mrb[44].mxu0 %vm183_vm6, %v3683_v2 }
0x1f08   :  { %5044 = vmatpush3.xpose.msk.msra.mxu0 %vm183_vm6, %v3836_v62  ;;  %5045 = vmatprep.mubr.msk.f32.mxu0 %vm5291_vm5, %v5290_v46 }
0x1f09   :  { %5053 = vmatprep.subr.mxu0 %v5290_v46 }
0x1f0b   :  { %5046 = vmatmul.mubr.msk.f32.vlgmr.msra.gmra.mrb[46].mxu0 %vm183_vm6, %v3834_v26 }
0x1f0c   :  { %5054 = vmatpush3.msra.mxu0 %v5819_v43  ;;  %5055 = vmatprep.mubr.msk.f32.mxu0 %vm5291_vm5, %v5290_v46 }
0x1f0d   :  { %5063 = vmatprep.subr.mxu0 %v5290_v46 }
0x1fd6   :  { %v3829_v4 = vpop.f32.mrb[42].mxu1 }
0x1fd7   :  { %v5042_v5 = vpop.f32.mrb[43].mxu1 }
0x1fda   :  { %v3756_v48 = vpop.f32.mrb[44].mxu0 }
0x1fdb   :  { %v3830_v6 = vadd.f32 %v3829_v4, %v3756_v48  ;;  %v5037_v7 = vpop.f32.mrb[45].mxu0 }
0x1fde   :  { %v3907_v9 = vpop.f32.mrb[46].mxu0 }
0x1fdf   :  { %v3911_v56 = vmul.f32 0.35355338, %v3907_v9  ;;  %v5047_v14 = vpop.f32.mrb[47].mxu0 }
0x1fe1   :  { %v3912_v11 = vadd.f32 %v5848_v24, %v3911_v56  ;;  %v4662_v56 = vld [vmem:[%s6016_s6 + $0x64] ss:$0 sm:$0xff] }
0x1fe3   :  { %v3913_v55 = vsel %vm183_vm6, %v3912_v11, -inf }
0x1fe4   :  { %3914 = vmax.xlane.f32.xlu0 %v3913_v55  ;;  %v4663_v55 = vld [vmem:[%s6016_s6 + $0x67] ss:$0 sm:$0xff] }
0x1ffa   :  { %3924 = vrot.lane.b32.xlu0 %v5806_v16, %s5297_s25 }
0x1ffe   :  { %4074 = vrot.lane.b32.xlu0 %v5815_v45, %s5302_s29 }
0x2071   :  { %v3915_v43 = vpop.xlane.xlu0 %3914 }
0x2072   :  { %v3916_v49 = vsub.f32 %v3912_v11, %v3915_v43 }
0x2074   :  { %v3917_v12 = vmul.f32 1.442695, %v3916_v49 }
0x2075   :  { %v3925_v13 = vpop.permute.xlu0 %3924 }
0x2076   :  { %5250 = vpow2.f32 %v3917_v12  ;;  %5049 = vmatpush3.msra.mxu1 %v3925_v13  ;;  %v4372_v12 = vld [vmem:[%s6016_s6] sm:$0xff]  ;;  %v4373_v13 = vld [vmem:[%s6016_s6 + $0x8] sm:$0xff] }
0x2077   :  { %5058 = vmatprep.subr.mxu1 %v5290_v46 }
0x2079   :  { %v4075_v23 = vpop.permute.xlu0 %4074 }
0x2080   :  { %v5251_v58 = vpop.eup %5250 }
0x2081   :  { %v3919_v17 = vsel %vm183_vm6, %v5251_v58, 0.0 }
0x2082   :  { %3920 = vadd.xlane.f32.xlu1 %v3919_v17  ;;  %v5127_v17 = vpack.c.bf16 %v4373_v13, %v4372_v12 }
0x2093   :  { %4076 = vrot.lane.b32.xlu1 %v5806_v16, %s5302_s29 }
0x210f   :  { %v3921_v19 = vpop.xlane.xlu1 %3920 }
0x2110   :  { %5252 = vrcp.f32 %v3921_v19  ;;  %v4375_v19 = vld [vmem:[%s6016_s6 + $0x18] sm:$0xff] }
0x2113   :  { %v4077_v45 = vpop.permute.xlu1 %4076 }
0x211a   :  { %v5253_v20 = vpop.eup %5252 }
0x211b   :  { %v3923_v21 = vmul.f32 %v5253_v20, %v5251_v58  ;;  %v4374_v58 = vld [vmem:[%s6016_s6 + $0x10] sm:$0xff] }
0x211c   :  { %v5131_v20 = vpack.c.bf16 %v4375_v19, %v4374_v58 }
0x211d   :  { %5051 = vmatmul.mubr.msk.f32.vlgmr.msra.gmra.mrb[44].mxu1 %vm183_vm6, %v3923_v21  ;;  %v4377_v21 = vld [vmem:[%s6016_s6 + $0x20] sm:$0xff] }
0x211e   :  { %5059 = vmatpush3.xpose.msk.msra.mxu1 %vm183_vm6, %v4077_v45  ;;  %5060 = vmatprep.mubr.msk.f32.mxu1 %vm5291_vm5, %v5290_v46  ;;  %v4378_v45 = vld [vmem:[%s6016_s6 + $0x28] sm:$0xff] }
0x211f   :  { %5068 = vmatprep.subr.mxu1 %v5290_v46 }
0x2121   :  { %5061 = vmatmul.mubr.msk.f32.vlgmr.msra.gmra.mrb[46].mxu1 %vm183_vm6, %v4075_v23  ;;  %v4379_v23 = vld [vmem:[%s6016_s6 + $0x30] sm:$0xff] }
0x2122   :  { %5069 = vmatpush3.msra.mxu1 %v5862_v36  ;;  %5070 = vmatprep.mubr.msk.f32.mxu1 %vm5291_vm5, %v5290_v46 }
0x21f0   :  { %v3996_v10 = vpop.f32.mrb[44].mxu1 }
0x21f1   :  { %v5052_v57 = vpop.f32.mrb[45].mxu1  ;;  %5056 = vmatmul.mubr.msk.f32.vlgmr.msra.gmra.mrb[48].mxu0 %vm183_vm6, %v3996_v10  ;;  %v5135_v10 = vpack.c.bf16 %v4378_v45, %v4377_v21 }
0x21f2   :  { %5065 = vmatprep.mubr.msk.f32.mxu0 %vm5291_vm5, %v5290_v46  ;;  %v4380_v57 = vld [vmem:[%s6016_s6 + $0x38] sm:$0xff] }
0x21f3   :  { %5136 = vmatprep.subr.bf16.mxu1 %v5135_v10 }
0x21f4   :  { %v4148_v15 = vpop.f32.mrb[46].mxu1 }
0x21f5   :  { %v4152_v25 = vmul.f32 0.35355338, %v4148_v15  ;;  %v5062_v28 = vpop.f32.mrb[47].mxu1  ;;  %v5139_v15 = vpack.c.bf16 %v4380_v57, %v4379_v23 }
0x21f6   :  { %v4382_v28 = vld [vmem:[%s6016_s6 + $0x48] sm:$0xff] }
0x21f7   :  { %v4153_v29 = vadd.f32 %v5848_v24, %v4152_v25  ;;  %v4381_v25 = vld [vmem:[%s6016_s6 + $0x40] sm:$0xff] }
0x21f9   :  { %v4154_v30 = vsel %vm183_vm6, %v4153_v29, -inf }
0x21fa   :  { %4155 = vmax.xlane.f32.xlu1 %v4154_v30 }
0x220b   :  { %3349 = vrot.lane.b32.xlu1 %v5687_v27, %s5296_s24  ;;  %s5304_s24 = smov [#allocation2]  }
0x220c   :  { %s4568_s25 = sshll.u32 %s5304_s24, 4  ;;  %s4569_s25 = int_to_ptr.vmem [resolvable:$true] %s4568_s25 }
0x220d   :  { %s5266_s26 = scalar_lea.vmem %s4569_s25, 256  ;;  %p5271_p1 = scmp.lt.s32.totalorder %s4569_s25, %s4569_s25 }
0x220e   :  { %p5267_p0 = scmp.ne.s32.totalorder %s4569_s25, %s5266_s26  ;;  %p5272_p2 = scmp.lt.s32.totalorder %s5266_s26, %s5266_s26 }
0x2210   :  { %p5273_p3 = por %p5272_p2, %p5271_p1 }
0x2212   :  { %p5274_p4 = pnand %p5273_p3, %p5267_p0 }
0x2287   :  { %v4156_v31 = vpop.xlane.xlu1 %4155 }
0x2288   :  { %v4157_v32 = vsub.f32 %v4153_v29, %v4156_v31  ;;  %v5143_v29 = vpack.c.bf16 %v4382_v28, %v4381_v25 }
0x228a   :  { %v4158_v33 = vmul.f32 1.442695, %v4157_v32 }
0x228b   :  { %v3350_v35 = vpop.permute.xlu1 %3349 }
0x228c   :  { %5254 = vpow2.f32 %v4158_v33  ;;  %v3352_v22 = vadd.f32 %v3350_v35, %v5883_v60 }
0x228e   :  { %v5926_v46 = vadd.f32 %v3352_v22, %v5620_v34 }
0x2290   :  { %v4320_v36 = vsel %vm33_vm0, %v5926_v46, 0.0 }
0x2291   :  { %4321 = vadd.xlane.f32.xlu1 %v4320_v36 }
0x2296   :  { %v5255_v24 = vpop.eup %5254 }
0x2297   :  { %v4160_v47 = vsel %vm183_vm6, %v5255_v24, 0.0 }
0x2298   :  { %4161 = vadd.xlane.f32.xlu0 %v4160_v47 }
0x22ae   :  { %4165 = vrot.lane.b32.xlu0 %v5806_v16, %s5301_s28 }
0x22c4   :  { %v4069_v27 = vpop.f32.mrb[48].mxu0 }
0x22c5   :  { %v4073_v18 = vadd.f32 %v4069_v27, %v3830_v6  ;;  %v5057_v8 = vpop.f32.mrb[49].mxu0 }
0x231e   :  { %v4322_v42 = vpop.xlane.xlu1 %4321 }
0x231f   :  { %v4326_v44 = vmul.f32 0.03125, %v4322_v42 }
0x2321   :  { %v4328_v53 = vsub.f32 %v5926_v46, %v4326_v44 }
0x2323   :  { %v4330_v60 = vmul.f32 %v4328_v53, %v4328_v53  ;;  %v4344_v14 = vmul.f32 %v4662_v56, %v4328_v53 }
0x2325   :  { %v4162_v37 = vpop.xlane.xlu0 %4161  ;;  %v4332_v41 = vsel %vm33_vm0, %v4330_v60, 0.0 }
0x2326   :  { %5256 = vrcp.f32 %v4162_v37  ;;  %v4383_v37 = vld [vmem:[%s6016_s6 + $0x50] sm:$0xff] }
0x2329   :  { %v4166_v38 = vpop.permute.xlu0 %4165 }
0x232a   :  { %5064 = vmatpush3.msra.mxu0 %v4166_v38  ;;  %v4384_v38 = vld [vmem:[%s6016_s6 + $0x58] sm:$0xff] }
0x232b   :  { %5128 = vmatprep.subr.bf16.mxu0 %v5127_v17 }
0x2330   :  { %v5257_v34 = vpop.eup %5256 }
0x2331   :  { %v4164_v39 = vmul.f32 %v5257_v34, %v5255_v24  ;;  %v5147_v34 = vpack.c.bf16 %v4384_v38, %v4383_v37 }
0x2333   :  { %5066 = vmatmul.mubr.msk.f32.vlgmr.msra.gmra.mrb[50].mxu0 %vm183_vm6, %v4164_v39  ;;  %v4664_v39 = vld [vmem:[%s6016_s6 + $0x60] ss:$0 sm:$0xff] }
0x2334   :  { %5130 = vmatpush3.bf16.msra.mxu0 %v5127_v17 }
0x2335   :  { %5132 = vmatprep.subr.bf16.mxu0 %v5131_v20 }
0x2338   :  { %5134 = vmatpush3.bf16.msra.mxu0 %v5131_v20 }
0x2406   :  { %v4237_v0 = vpop.f32.mrb[50].mxu0 }
0x2407   :  { %v5067_v40 = vpop.f32.mrb[51].mxu0  ;;  %5071 = vmatmul.mubr.msk.f32.vlgmr.msra.gmra.mrb[48].mxu1 %vm183_vm6, %v4237_v0 }
0x2408   :  { %5138 = vmatpush3.bf16.msra.mxu1 %v5135_v10 }
0x2409   :  { %5140 = vmatprep.subr.bf16.mxu1 %v5139_v15 }
0x240c   :  { %5142 = vmatpush3.bf16.msra.mxu1 %v5139_v15 }
0x240d   :  { %5144 = vmatprep.subr.bf16.mxu1 %v5143_v29 }
0x2410   :  { %5146 = vmatpush3.bf16.msra.mxu1 %v5143_v29 }
0x2411   :  { %5148 = vmatprep.subr.bf16.mxu1 %v5147_v34 }
0x2414   :  { %5150 = vmatpush3.bf16.msra.mxu1 %v5147_v34 }
0x24da   :  { %v4310_v63 = vpop.f32.mrb[48].mxu1 }
0x24db   :  { %v4314_v52 = vadd.f32 %v4310_v63, %v4073_v18  ;;  %v5072_v16 = vpop.f32.mrb[49].mxu1 }
0x24dc   :  { %v4667_v16 = vld [vmem:[%s6016_s6 + $0x61] ss:$0 sm:$0xff] }
0x24dd   :  { %v4315_v54 = vadd.f32 %v4314_v52, %v3350_v35 }
0x24df   :  { %v5937_v1 = vadd.f32 %v4315_v54, %v5631_v50 }
0x24e1   :  { %v4323_v59 = vsel %vm33_vm0, %v5937_v1, 0.0 }
0x24e2   :  { %4324 = vadd.xlane.f32.xlu0 %v4323_v59 }
0x24e6   :  { %4333 = vadd.xlane.f32.xlu0 %v4332_v41 }
0x256f   :  { %v4325_v51 = vpop.xlane.xlu0 %4324 }
0x2570   :  { %v4327_v61 = vmul.f32 0.03125, %v4325_v51 }
0x2572   :  { %v4329_v62 = vsub.f32 %v5937_v1, %v4327_v61 }
0x2573   :  { %v4334_v2 = vpop.xlane.xlu0 %4333 }
0x2574   :  { %v4338_v3 = vmul.f32 0.032258064, %v4334_v2  ;;  %v4331_v26 = vmul.f32 %v4329_v62, %v4329_v62  ;;  %v4345_v47 = vmul.f32 %v4662_v56, %v4329_v62 }
0x2576   :  { %5258 = vrsqrt.f32 %v4338_v3  ;;  %v4335_v4 = vsel %vm33_vm0, %v4331_v26, 0.0  ;;  %vm4348_vm11 = vcmp.eq.f32.partialorder %v4338_v3, inf  ;;  %v4351_v48 = vand.u32 2147483648, %v4338_v3 }
0x2577   :  { %4336 = vadd.xlane.f32.xlu0 %v4335_v4  ;;  %vm4350_vm12 = vcmp.eq.f32.partialorder %v4338_v3, 0.0 }
0x2580   :  { %v5259_v50 = vpop.eup %5258 }
0x2581   :  { %v4347_v5 = vmul.f32 %v5259_v50, %v4338_v3 }
0x2583   :  { %v4349_v6 = vsel %vm4348_vm11, %v4338_v3, %v4347_v5 }
0x2584   :  { %v4352_v7 = vsel %vm4350_vm12, %v4351_v48, %v4349_v6 }
0x2585   :  { %v4360_v9 = vadd.f32 1e-06, %v4352_v7 }
0x2587   :  { %5260 = vrcp.f32 %v4360_v9 }
0x2591   :  { %v5261_v11 = vpop.eup %5260 }
0x2592   :  { %v4363_v43 = vmul.f32 %v5261_v11, %v4344_v14 }
0x2594   :  { %v4370_v49 = vadd.f32 %v4663_v55, %v4363_v43 }
0x2596   :  { %5081 = vmatprep.mubr.msk.f32.mxu0 %vm33_vm0, %v4370_v49 }
0x2604   :  { %v4337_v30 = vpop.xlane.xlu0 %4336 }
0x2605   :  { %v4339_v31 = vmul.f32 0.032258064, %v4337_v30 }
0x2607   :  { %5262 = vrsqrt.f32 %v4339_v31  ;;  %vm4355_vm13 = vcmp.eq.f32.partialorder %v4339_v31, inf  ;;  %v4358_v35 = vand.u32 2147483648, %v4339_v31  ;;  %vm4357_vm14 = vcmp.eq.f32.partialorder %v4339_v31, 0.0 }
0x2611   :  { %v5263_v32 = vpop.eup %5262 }
0x2612   :  { %v4354_v33 = vmul.f32 %v5263_v32, %v4339_v31 }
0x2614   :  { %v4356_v22 = vsel %vm4355_vm13, %v4339_v31, %v4354_v33 }
0x2615   :  { %v4359_v36 = vsel %vm4357_vm14, %v4358_v35, %v4356_v22 }
0x2616   :  { %v4361_v24 = vadd.f32 1e-06, %v4359_v36 }
0x2618   :  { %5264 = vrcp.f32 %v4361_v24 }
0x2622   :  { %v5265_v27 = vpop.eup %5264 }
0x2623   :  { %v4365_v18 = vmul.f32 %v5265_v27, %v4345_v47 }
0x2625   :  { %v4371_v8 = vadd.f32 %v4663_v55, %v4365_v18 }
0x2627   :  { %5082 = vmatmul.mubr.msk.f32.vlgmr.msra.gmra.mrb[52].mxu0 %vm33_vm0, %v4371_v8 }
0x26fa   :  { %v5083_v0 = vpop.f32.mrb[52].mxu0 }
0x26fb   :  { %v4468_v40 = vadd.f32 %v5083_v0, %v4664_v39  ;;  %v4462_v42 = vpop.f32.mrb[53].mxu0 }
0x26fc   :  { %v4463_v44 = vadd.f32 %v4664_v39, %v4462_v42 }
0x26fd   :  { %v4472_v52 = vmax.f32 %v4468_v40, 0.0 }
0x26fe   :  { %v4471_v63 = vmax.f32 %v4463_v44, 0.0 }
0x2700   :  { %5100 = vmatprep.mubr.msk.f32.mxu1 %vm4477_vm15, %v4471_v63 }
0x2701   :  { %5101 = vmatmul.mubr.msk.f32.vlgmr.msra.gmra.mrb[50].mxu1 %vm4477_vm15, %v4472_v52 }
0x27d4   :  { %v5102_v53 = vpop.f32.mrb[50].mxu1 }
0x27d5   :  { %v4556_v54 = vadd.f32 %v5102_v53, %v4667_v16  ;;  %v4550_v59 = vpop.f32.mrb[51].mxu1 }
0x27d6   :  { %v4551_v60 = vadd.f32 %v4667_v16, %v4550_v59 }
0x27d7   :  { %v4560_v41 = vadd.f32 %v4556_v54, %v5937_v1 }
0x27d8   :  { %v4559_v51 = vadd.f32 %v4551_v60, %v5926_v46 }
0x27d9   :  { %4562 = vst.msk [vmem:[#allocation2 + $0x8] sm:$0xff] %vm33_vm0, %v4560_v41 }
0x27da   :  { %4561 = vst.msk [vmem:[#allocation2] sm:$0xff] %vm33_vm0, %v4559_v51 }
0x27db   :  { %5277 = shalt.err (!%p5274_p4)
}
0x27dc   :  { %s5278_s29 = scalar_lea.hbm %s6017_s7, 256 }
0x27dd   :  { %p5279_p5 = scmp.ne.s32.totalorder %s6017_s7, %s5278_s29  ;;  %p5282_p6 = scmp.lt.u32.totalorder %s5278_s29, %s6017_s7 }
0x27df   :  { %p5284_p7 = pnand %p5282_p6, %p5279_p5 }
0x27e1   :  { %5287 = shalt.err (!%p5284_p7)
}
0x27e2   :  { %s5305_s14 = smov 128   ;;  %s5306_s15 = smov 8  }
0x27e3   :  { %4574 = dma.vmem_to_hbm [thread:$0]  %s4569_s25, 256, %s6017_s7, [#allocation3], %s5305_s14, %s5305_s14, %s5306_s15  }
0x27e4   :  { %5288 = dma.done.wait [#allocation3], 256  }
0x27e5   :  { %5289 = vsyncadd [#allocation3], 4294967040 }
0x27e6   :  { %4578 = vsyncpa [#allocation3], 1 }

</bundles_post_ra>
